<compile_context>
chip_gen: v7x
topology: tpu7x:2x2x1
jax: 0.10.0
libtpu: 0.0.40
codegen_flags: <defaults>
</compile_context>

<pallas_src>
import functools

import jax
import jax.numpy as jnp
from jax.experimental import pallas as pl
from jax.experimental.pallas import tpu as pltpu


def pheromone_attention_kernel(
    q_ref, k_ref, v_ref, pos_ref, mask_ref,
    w_sp1_ref, w_sp2_ref, w_slab_ref,
    w_qkv_ref, b_qkv_ref, wo_hm_ref, b_rows_ref,
    out_ref, attn_ref,
    *, num_heads,
):
    f32 = jnp.float32
    bt, S, H = q_ref.shape
    nh = num_heads
    hd = H // nh
    H4 = w_sp1_ref.shape[1]
    R = bt * S          # rows packed per grid step
    G = nh * bt         # independent (head, batch) attention groups

    q = q_ref[...].reshape(R, H).astype(f32)
    k = k_ref[...].reshape(R, H).astype(f32)
    v = v_ref[...].reshape(R, H).astype(f32)
    pos = pos_ref[...].reshape(R, 3).astype(f32)

    # bias row-stack: 0=bs1 (padded to H), 1=bs2, 2=bp, 3=bo, 4=bg
    b_rows = b_rows_ref[...].astype(f32)
    bs1 = b_rows[0:1, :H4]
    bs2 = b_rows[1:2, :]
    bp = b_rows[2:3, :]
    bo = b_rows[3:4, :]
    bg = b_rows[4:5, :]

    # --- spatial encoder: Linear(3, H/4) -> ReLU -> Linear(H/4, H) ---
    h1 = jnp.dot(pos, w_sp1_ref[...], preferred_element_type=f32) + bs1
    h1 = jnp.maximum(h1, 0.0)
    spatial = jnp.dot(h1, w_sp2_ref[...], preferred_element_type=f32) + bs2

    eq = q + spatial
    ek = k + spatial

    # --- packed (H, 3H) weight slab: [pheromone | gate_attended | gate_query]
    w_slab = w_slab_ref[...]
    w_ph = w_slab[:, 0 * H:1 * H]
    w_ga = w_slab[:, 1 * H:2 * H]
    w_gq = w_slab[:, 2 * H:3 * H]

    # pheromone_encoder: Linear(H, H) -> tanh
    pher = jnp.tanh(jnp.dot(ek, w_ph, preferred_element_type=f32) + bp)

    # --- head-major in-projections (softmax scale pre-folded into Q) ---
    w_qkv = w_qkv_ref[...]   # (3, nh, H, hd)
    b_qkv = b_qkv_ref[...]   # (3, nh, 1, hd)

    def in_proj(x_rows, idx):
        xb = jnp.broadcast_to(x_rows[None], (nh, R, H))
        y = jax.lax.dot_general(
            xb, w_qkv[idx], (((2,), (1,)), ((0,), (0,))),
            preferred_element_type=f32)
        return y + b_qkv[idx]                    # (nh, R, hd)

    Qh = in_proj(eq, 0)
    Kh = in_proj(pher, 1)
    Vh = in_proj(v, 2)

    # regroup (head, batch) into the leading axis -> (G, S, hd)
    Qg = Qh.reshape(G, S, hd)
    Kg = Kh.reshape(G, S, hd)
    Vg = Vh.reshape(G, S, hd)

    # --- single batched softmax attention over all (head, batch) groups ---
    scores = jax.lax.dot_general(
        Qg, Kg, (((2,), (2,)), ((0,), (0,))), preferred_element_type=f32)
    m = jnp.max(scores, axis=-1, keepdims=True)
    e = jnp.exp(scores - m)
    p = e * pl.reciprocal(jnp.sum(e, axis=-1, keepdims=True), approx=True)

    og = jax.lax.dot_general(
        p, Vg, (((2,), (1,)), ((0,), (0,))), preferred_element_type=f32)

    # --- output projection: sum_h out_h @ Wo[h]  (== concat(heads) @ Wo) ---
    oh = og.reshape(nh, R, hd)
    attended = jnp.sum(
        jax.lax.dot_general(oh, wo_hm_ref[...], (((2,), (1,)), ((0,), (0,))),
                            preferred_element_type=f32),
        axis=0) + bo                                            # (R, H)

    # --- neighborhood gate (split 2H->H weight == two H->H matmuls) ---
    g = jax.nn.sigmoid(
        jnp.dot(attended, w_ga, preferred_element_type=f32)
        + jnp.dot(q, w_gq, preferred_element_type=f32)
        + bg)
    gated = g * attended + (1.0 - g) * q

    # --- head-averaged attention weights, masked ---
    attn_avg = jnp.mean(p.reshape(nh, bt, S, S), axis=0)        # (bt, S, S)
    masked = attn_avg * mask_ref[...].astype(f32)

    out_ref[...] = gated.reshape(bt, S, H).astype(out_ref.dtype)
    attn_ref[...] = masked.astype(attn_ref.dtype)


def _const_spec(shape):
    nd = len(shape)
    return pl.BlockSpec(shape, lambda b, _nd=nd: (0,) * _nd)


def _choose_batch_tile(B, S, target_rows=256):
    """Pack batch elements per grid step toward ~target_rows MXU rows, but keep
    at least 2 grid steps when B >= 2 so both v7x TensorCores get work (the
    extra step is a no-op cost on single-TC v5e/v6e)."""
    cap_steps = B // 2 if B >= 2 else B
    bt = 1
    for d in range(1, B + 1):
        if B % d == 0 and d * S <= target_rows and d <= cap_steps:
            bt = d
    return max(bt, 1)


def pheromone_attention(q, k, v, positions, distance_mask, packed, num_heads):
    B, S, H = q.shape
    bt = _choose_batch_tile(B, S)
    grid = (B // bt,)

    act_spec = pl.BlockSpec((bt, S, H), lambda b: (b, 0, 0))
    pos_spec = pl.BlockSpec((bt, S, 3), lambda b: (b, 0, 0))
    mask_spec = pl.BlockSpec((bt, S, S), lambda b: (b, 0, 0))
    weight_specs = [_const_spec(p.shape) for p in packed]

    kernel = functools.partial(pheromone_attention_kernel, num_heads=num_heads)

    out, attn = pl.pallas_call(
        kernel,
        out_shape=(
            jax.ShapeDtypeStruct((B, S, H), q.dtype),
            jax.ShapeDtypeStruct((B, S, S), jnp.float32),
        ),
        grid_spec=pltpu.PrefetchScalarGridSpec(
            num_scalar_prefetch=0,
            grid=grid,
            in_specs=[act_spec, act_spec, act_spec, pos_spec, mask_spec]
            + weight_specs,
            out_specs=(act_spec, mask_spec),
        ),
        compiler_params=pltpu.CompilerParams(
            dimension_semantics=("parallel",),
        ),
    )(q, k, v, positions, distance_mask, *packed)
    return out, attn


def init_raw_params(key, H):
    """Deterministic synthetic parameters in x @ W form (1-D biases)."""
    H4 = H // 4
    ks = jax.random.split(key, 12)
    s = 0.1
    # PyTorch-layout weights: Linear(in, out).weight has shape (out, in)
    ws1_t = jax.random.normal(ks[0], (H4, 3), jnp.float32) * s
    bs1 = jax.random.normal(ks[1], (H4,), jnp.float32) * s
    ws2_t = jax.random.normal(ks[2], (H, H4), jnp.float32) * s
    bs2 = jax.random.normal(ks[3], (H,), jnp.float32) * s
    wp_t = jax.random.normal(ks[4], (H, H), jnp.float32) * s
    bp = jax.random.normal(ks[5], (H,), jnp.float32) * s
    in_proj_w = jax.random.normal(ks[6], (3 * H, H), jnp.float32) * s
    in_proj_b = jax.random.normal(ks[7], (3 * H,), jnp.float32) * s
    wo_t = jax.random.normal(ks[8], (H, H), jnp.float32) * s
    bo = jax.random.normal(ks[9], (H,), jnp.float32) * s
    wg_t = jax.random.normal(ks[10], (H, 2 * H), jnp.float32) * s
    bg = jax.random.normal(ks[11], (H,), jnp.float32) * s

    return dict(
        ws1=ws1_t.T, bs1=bs1, ws2=ws2_t.T, bs2=bs2,
        wp=wp_t.T, bp=bp,
        wq=in_proj_w[:H].T, bq=in_proj_b[:H],
        wk=in_proj_w[H:2 * H].T, bk=in_proj_b[H:2 * H],
        wv=in_proj_w[2 * H:].T, bv=in_proj_b[2 * H:],
        wo=wo_t.T, bo=bo,
        wg_a=wg_t.T[:H], wg_q=wg_t.T[H:], bg=bg,
    )


def pack_params(raw, H, num_heads):
    """Consolidate the 17 raw tensors into 7 kernel inputs; fold the softmax
    scale into the Q projection; lay attention weights out head-major."""
    H4 = H // 4
    nh = num_heads
    hd = H // nh
    scale = 1.0 / (hd ** 0.5)

    def head_major(w):            # (H, H) x@W weight -> (nh, H, hd)
        return jnp.transpose(w.reshape(H, nh, hd), (1, 0, 2))

    w_qkv_hm = jnp.stack(
        [head_major(raw["wq"] * scale), head_major(raw["wk"]),
         head_major(raw["wv"])], axis=0)                         # (3, nh, H, hd)
    b_qkv_hm = jnp.stack(
        [(raw["bq"] * scale).reshape(nh, 1, hd),
         raw["bk"].reshape(nh, 1, hd),
         raw["bv"].reshape(nh, 1, hd)], axis=0)                  # (3, nh, 1, hd)
    wo_hm = raw["wo"].reshape(nh, hd, H)                         # (nh, hd, H)
    w_slab = jnp.concatenate(
        [raw["wp"], raw["wg_a"], raw["wg_q"]], axis=1)           # (H, 3H)
    b_rows = jnp.stack([
        jnp.pad(raw["bs1"], (0, H - H4)),
        raw["bs2"], raw["bp"], raw["bo"], raw["bg"]], axis=0)    # (5, H)

    return (raw["ws1"], raw["ws2"], w_slab, w_qkv_hm, b_qkv_hm, wo_hm, b_rows)


def reference_forward(q, k, v, positions, distance_mask, raw, num_heads):
    """Pure-JAX reference mirroring the PyTorch module semantics."""
    B, S, H = q.shape
    hd = H // num_heads

    spatial = jnp.maximum(positions @ raw["ws1"] + raw["bs1"], 0.0) @ raw["ws2"] + raw["bs2"]
    eq = q + spatial
    ek = k + spatial
    pher = jnp.tanh(ek @ raw["wp"] + raw["bp"])

    Q = eq @ raw["wq"] + raw["bq"]
    K = pher @ raw["wk"] + raw["bk"]
    V = v @ raw["wv"] + raw["bv"]

    Qh = Q.reshape(B, S, num_heads, hd).transpose(0, 2, 1, 3)
    Kh = K.reshape(B, S, num_heads, hd).transpose(0, 2, 1, 3)
    Vh = V.reshape(B, S, num_heads, hd).transpose(0, 2, 1, 3)
    scores = jnp.einsum("bhqd,bhkd->bhqk", Qh, Kh) / (hd ** 0.5)
    p = jax.nn.softmax(scores, axis=-1)
    oh = jnp.einsum("bhqk,bhkd->bhqd", p, Vh)
    attended = oh.transpose(0, 2, 1, 3).reshape(B, S, H) @ raw["wo"] + raw["bo"]
    attn_avg = jnp.mean(p, axis=1)

    g = jax.nn.sigmoid(attended @ raw["wg_a"] + q @ raw["wg_q"] + raw["bg"])
    gated = g * attended + (1.0 - g) * q
    return gated, attn_avg * distance_mask


if __name__ == "__main__":
    B, S, H, NUM_HEADS = 2, 8, 32, 8

    key = jax.random.PRNGKey(0)
    kq, kk, kv, kp, kw = jax.random.split(key, 5)
    q = jax.random.normal(kq, (B, S, H), jnp.float32)
    k = jax.random.normal(kk, (B, S, H), jnp.float32)
    v = jax.random.normal(kv, (B, S, H), jnp.float32)
    positions = jax.random.normal(kp, (B, S, 3), jnp.float32)
    # local-neighborhood mask from pairwise distances
    d = jnp.linalg.norm(positions[:, :, None, :] - positions[:, None, :, :], axis=-1)
    distance_mask = (d < 1.5).astype(jnp.float32)

    raw = init_raw_params(kw, H)
    packed = pack_params(raw, H, NUM_HEADS)

    out, masked_attn = pheromone_attention(
        q, k, v, positions, distance_mask, packed, NUM_HEADS
    )
    jax.block_until_ready((out, masked_attn))

    ref_out, ref_attn = reference_forward(
        q, k, v, positions, distance_mask, raw, NUM_HEADS
    )
    assert out.shape == (B, S, H) and masked_attn.shape == (B, S, S)
    # tolerance loosened vs v1 because the softmax denominator now uses the
    # approximate (EUP) reciprocal per the perf review
    assert jnp.allclose(out, ref_out, atol=1e-2, rtol=1e-2), \
        float(jnp.max(jnp.abs(out - ref_out)))
    assert jnp.allclose(masked_attn, ref_attn, atol=1e-2, rtol=1e-2), \
        float(jnp.max(jnp.abs(masked_attn - ref_attn)))

    print("KERNEL_OK")
</pallas_src>

<mosaic_0001>
module attributes {stable_mosaic.version = 11 : i64} {
  func.func @pheromone_attention_kernel(%arg0: i32, %arg1: memref<1x8x32xf32, #tpu.memory_space<vmem>>, %arg2: memref<1x8x32xf32, #tpu.memory_space<vmem>>, %arg3: memref<1x8x32xf32, #tpu.memory_space<vmem>>, %arg4: memref<1x8x3xf32, #tpu.memory_space<vmem>>, %arg5: memref<1x8x8xf32, #tpu.memory_space<vmem>>, %arg6: memref<3x8xf32, #tpu.memory_space<vmem>>, %arg7: memref<8x32xf32, #tpu.memory_space<vmem>>, %arg8: memref<32x96xf32, #tpu.memory_space<vmem>>, %arg9: memref<3x8x32x4xf32, #tpu.memory_space<vmem>>, %arg10: memref<3x8x1x4xf32, #tpu.memory_space<vmem>>, %arg11: memref<8x4x32xf32, #tpu.memory_space<vmem>>, %arg12: memref<5x32xf32, #tpu.memory_space<vmem>>, %arg13: memref<1x8x32xf32, #tpu.memory_space<vmem>>, %arg14: memref<1x8x8xf32, #tpu.memory_space<vmem>>) attributes {dimension_semantics = [#tpu.dimension_semantics<parallel>], iteration_bounds = array<i64: 2>, scalar_prefetch = 0 : i64, scratch_operands = 0 : i64, tpu.core_type = #tpu.core_type<tc>, window_params = [{transform_indices = @transform_0, window_bounds = array<i64: 1, 8, 32>}, {transform_indices = @transform_1, window_bounds = array<i64: 1, 8, 32>}, {transform_indices = @transform_2, window_bounds = array<i64: 1, 8, 32>}, {transform_indices = @transform_3, window_bounds = array<i64: 1, 8, 3>}, {transform_indices = @transform_4, window_bounds = array<i64: 1, 8, 8>}, {pipeline_mode = #tpu.pipeline_mode<synchronous>, transform_indices = @transform_5, window_bounds = array<i64: 3, 8>}, {pipeline_mode = #tpu.pipeline_mode<synchronous>, transform_indices = @transform_6, window_bounds = array<i64: 8, 32>}, {pipeline_mode = #tpu.pipeline_mode<synchronous>, transform_indices = @transform_7, window_bounds = array<i64: 32, 96>}, {pipeline_mode = #tpu.pipeline_mode<synchronous>, transform_indices = @transform_8, window_bounds = array<i64: 3, 8, 32, 4>}, {pipeline_mode = #tpu.pipeline_mode<synchronous>, transform_indices = @transform_9, window_bounds = array<i64: 3, 8, 1, 4>}, {pipeline_mode = #tpu.pipeline_mode<synchronous>, transform_indices = @transform_10, window_bounds = array<i64: 8, 4, 32>}, {pipeline_mode = #tpu.pipeline_mode<synchronous>, transform_indices = @transform_11, window_bounds = array<i64: 5, 32>}, {transform_indices = @transform_12, window_bounds = array<i64: 1, 8, 32>}, {transform_indices = @transform_13, window_bounds = array<i64: 1, 8, 8>}]} {
    %c0 = arith.constant 0 : index
    %c0_0 = arith.constant 0 : index
    %c0_1 = arith.constant 0 : index
    %0 = vector.load %arg1[%c0, %c0_0, %c0_1] : memref<1x8x32xf32, #tpu.memory_space<vmem>>, vector<1x8x32xf32>
    %1 = vector.shape_cast %0 : vector<1x8x32xf32> to vector<8x32xf32>
    %c0_2 = arith.constant 0 : index
    %c0_3 = arith.constant 0 : index
    %c0_4 = arith.constant 0 : index
    %2 = vector.load %arg2[%c0_2, %c0_3, %c0_4] : memref<1x8x32xf32, #tpu.memory_space<vmem>>, vector<1x8x32xf32>
    %3 = vector.shape_cast %2 : vector<1x8x32xf32> to vector<8x32xf32>
    %c0_5 = arith.constant 0 : index
    %c0_6 = arith.constant 0 : index
    %c0_7 = arith.constant 0 : index
    %4 = vector.load %arg3[%c0_5, %c0_6, %c0_7] : memref<1x8x32xf32, #tpu.memory_space<vmem>>, vector<1x8x32xf32>
    %5 = vector.shape_cast %4 : vector<1x8x32xf32> to vector<8x32xf32>
    %c0_8 = arith.constant 0 : index
    %c0_9 = arith.constant 0 : index
    %c0_10 = arith.constant 0 : index
    %6 = vector.load %arg4[%c0_8, %c0_9, %c0_10] : memref<1x8x3xf32, #tpu.memory_space<vmem>>, vector<1x8x3xf32>
    %7 = vector.shape_cast %6 : vector<1x8x3xf32> to vector<8x3xf32>
    %c0_11 = arith.constant 0 : index
    %c0_12 = arith.constant 0 : index
    %8 = vector.load %arg12[%c0_11, %c0_12] : memref<5x32xf32, #tpu.memory_space<vmem>>, vector<5x32xf32>
    %9 = vector.extract_strided_slice %8 {offsets = [0, 0], sizes = [1, 8], strides = [1, 1]} : vector<5x32xf32> to vector<1x8xf32>
    %10 = vector.extract_strided_slice %8 {offsets = [1, 0], sizes = [1, 32], strides = [1, 1]} : vector<5x32xf32> to vector<1x32xf32>
    %11 = vector.extract_strided_slice %8 {offsets = [2, 0], sizes = [1, 32], strides = [1, 1]} : vector<5x32xf32> to vector<1x32xf32>
    %12 = vector.extract_strided_slice %8 {offsets = [3, 0], sizes = [1, 32], strides = [1, 1]} : vector<5x32xf32> to vector<1x32xf32>
    %13 = vector.extract_strided_slice %8 {offsets = [4, 0], sizes = [1, 32], strides = [1, 1]} : vector<5x32xf32> to vector<1x32xf32>
    %c0_13 = arith.constant 0 : index
    %c0_14 = arith.constant 0 : index
    %14 = vector.load %arg6[%c0_13, %c0_14] : memref<3x8xf32, #tpu.memory_space<vmem>>, vector<3x8xf32>
    %cst = arith.constant dense<0.000000e+00> : vector<8x8xf32>
    %15 = tpu.matmul %7, %14, %cst {dimension_numbers = #tpu.dot_dimension_numbers<[1], [0], [0], [1], [0, 0, 1, 1], [], []>} : vector<8x3xf32>, vector<3x8xf32>, vector<8x8xf32> -> vector<8x8xf32>
    %16 = vector.broadcast %9 : vector<1x8xf32> to vector<8x8xf32>
    %17 = arith.addf %15, %16 : vector<8x8xf32>
    %cst_15 = arith.constant 0.000000e+00 : f32
    %18 = vector.broadcast %cst_15 : f32 to vector<8x8xf32>
    %19 = arith.maximumf %17, %18 : vector<8x8xf32>
    %c0_16 = arith.constant 0 : index
    %c0_17 = arith.constant 0 : index
    %20 = vector.load %arg7[%c0_16, %c0_17] : memref<8x32xf32, #tpu.memory_space<vmem>>, vector<8x32xf32>
    %cst_18 = arith.constant dense<0.000000e+00> : vector<8x32xf32>
    %21 = tpu.matmul %19, %20, %cst_18 {dimension_numbers = #tpu.dot_dimension_numbers<[1], [0], [0], [1], [0, 0, 1, 1], [], []>} : vector<8x8xf32>, vector<8x32xf32>, vector<8x32xf32> -> vector<8x32xf32>
    %22 = vector.broadcast %10 : vector<1x32xf32> to vector<8x32xf32>
    %23 = arith.addf %21, %22 : vector<8x32xf32>
    %24 = arith.addf %1, %23 : vector<8x32xf32>
    %25 = arith.addf %3, %23 : vector<8x32xf32>
    %c0_19 = arith.constant 0 : index
    %c0_20 = arith.constant 0 : index
    %26 = vector.load %arg8[%c0_19, %c0_20] : memref<32x96xf32, #tpu.memory_space<vmem>>, vector<32x96xf32>
    %27 = vector.extract_strided_slice %26 {offsets = [0, 0], sizes = [32, 32], strides = [1, 1]} : vector<32x96xf32> to vector<32x32xf32>
    %28 = vector.extract_strided_slice %26 {offsets = [0, 32], sizes = [32, 32], strides = [1, 1]} : vector<32x96xf32> to vector<32x32xf32>
    %29 = vector.extract_strided_slice %26 {offsets = [0, 64], sizes = [32, 32], strides = [1, 1]} : vector<32x96xf32> to vector<32x32xf32>
    %cst_21 = arith.constant dense<0.000000e+00> : vector<8x32xf32>
    %30 = tpu.matmul %25, %27, %cst_21 {dimension_numbers = #tpu.dot_dimension_numbers<[1], [0], [0], [1], [0, 0, 1, 1], [], []>} : vector<8x32xf32>, vector<32x32xf32>, vector<8x32xf32> -> vector<8x32xf32>
    %31 = vector.broadcast %11 : vector<1x32xf32> to vector<8x32xf32>
    %32 = arith.addf %30, %31 : vector<8x32xf32>
    %33 = math.tanh %32 : vector<8x32xf32>
    %c0_22 = arith.constant 0 : index
    %c0_23 = arith.constant 0 : index
    %c0_24 = arith.constant 0 : index
    %c0_25 = arith.constant 0 : index
    %34 = vector.load %arg9[%c0_22, %c0_23, %c0_24, %c0_25] : memref<3x8x32x4xf32, #tpu.memory_space<vmem>>, vector<3x8x32x4xf32>
    %c0_26 = arith.constant 0 : index
    %c0_27 = arith.constant 0 : index
    %c0_28 = arith.constant 0 : index
    %c0_29 = arith.constant 0 : index
    %35 = vector.load %arg10[%c0_26, %c0_27, %c0_28, %c0_29] : memref<3x8x1x4xf32, #tpu.memory_space<vmem>>, vector<3x8x1x4xf32>
    %36 = vector.shape_cast %24 : vector<8x32xf32> to vector<1x8x32xf32>
    %37 = vector.shape_cast %36 : vector<1x8x32xf32> to vector<1x8x32xf32>
    %38 = vector.broadcast %37 : vector<1x8x32xf32> to vector<8x8x32xf32>
    %39 = vector.extract_strided_slice %34 {offsets = [0, 0, 0, 0], sizes = [1, 8, 32, 4], strides = [1, 1, 1, 1]} : vector<3x8x32x4xf32> to vector<1x8x32x4xf32>
    %40 = vector.shape_cast %39 : vector<1x8x32x4xf32> to vector<8x32x4xf32>
    %cst_30 = arith.constant dense<0.000000e+00> : vector<8x8x4xf32>
    %41 = tpu.matmul %38, %40, %cst_30 {dimension_numbers = #tpu.dot_dimension_numbers<[2], [1], [1], [2], [0, 0, 0, 1, 1, 2], [0], [0]>} : vector<8x8x32xf32>, vector<8x32x4xf32>, vector<8x8x4xf32> -> vector<8x8x4xf32>
    %42 = vector.extract_strided_slice %35 {offsets = [0, 0, 0, 0], sizes = [1, 8, 1, 4], strides = [1, 1, 1, 1]} : vector<3x8x1x4xf32> to vector<1x8x1x4xf32>
    %43 = vector.shape_cast %42 : vector<1x8x1x4xf32> to vector<8x1x4xf32>
    %44 = vector.broadcast %43 : vector<8x1x4xf32> to vector<8x8x4xf32>
    %45 = arith.addf %41, %44 : vector<8x8x4xf32>
    %46 = vector.shape_cast %33 : vector<8x32xf32> to vector<1x8x32xf32>
    %47 = vector.shape_cast %46 : vector<1x8x32xf32> to vector<1x8x32xf32>
    %48 = vector.broadcast %47 : vector<1x8x32xf32> to vector<8x8x32xf32>
    %49 = vector.extract_strided_slice %34 {offsets = [1, 0, 0, 0], sizes = [1, 8, 32, 4], strides = [1, 1, 1, 1]} : vector<3x8x32x4xf32> to vector<1x8x32x4xf32>
    %50 = vector.shape_cast %49 : vector<1x8x32x4xf32> to vector<8x32x4xf32>
    %cst_31 = arith.constant dense<0.000000e+00> : vector<8x8x4xf32>
    %51 = tpu.matmul %48, %50, %cst_31 {dimension_numbers = #tpu.dot_dimension_numbers<[2], [1], [1], [2], [0, 0, 0, 1, 1, 2], [0], [0]>} : vector<8x8x32xf32>, vector<8x32x4xf32>, vector<8x8x4xf32> -> vector<8x8x4xf32>
    %52 = vector.extract_strided_slice %35 {offsets = [1, 0, 0, 0], sizes = [1, 8, 1, 4], strides = [1, 1, 1, 1]} : vector<3x8x1x4xf32> to vector<1x8x1x4xf32>
    %53 = vector.shape_cast %52 : vector<1x8x1x4xf32> to vector<8x1x4xf32>
    %54 = vector.broadcast %53 : vector<8x1x4xf32> to vector<8x8x4xf32>
    %55 = arith.addf %51, %54 : vector<8x8x4xf32>
    %56 = vector.shape_cast %5 : vector<8x32xf32> to vector<1x8x32xf32>
    %57 = vector.shape_cast %56 : vector<1x8x32xf32> to vector<1x8x32xf32>
    %58 = vector.broadcast %57 : vector<1x8x32xf32> to vector<8x8x32xf32>
    %59 = vector.extract_strided_slice %34 {offsets = [2, 0, 0, 0], sizes = [1, 8, 32, 4], strides = [1, 1, 1, 1]} : vector<3x8x32x4xf32> to vector<1x8x32x4xf32>
    %60 = vector.shape_cast %59 : vector<1x8x32x4xf32> to vector<8x32x4xf32>
    %cst_32 = arith.constant dense<0.000000e+00> : vector<8x8x4xf32>
    %61 = tpu.matmul %58, %60, %cst_32 {dimension_numbers = #tpu.dot_dimension_numbers<[2], [1], [1], [2], [0, 0, 0, 1, 1, 2], [0], [0]>} : vector<8x8x32xf32>, vector<8x32x4xf32>, vector<8x8x4xf32> -> vector<8x8x4xf32>
    %62 = vector.extract_strided_slice %35 {offsets = [2, 0, 0, 0], sizes = [1, 8, 1, 4], strides = [1, 1, 1, 1]} : vector<3x8x1x4xf32> to vector<1x8x1x4xf32>
    %63 = vector.shape_cast %62 : vector<1x8x1x4xf32> to vector<8x1x4xf32>
    %64 = vector.broadcast %63 : vector<8x1x4xf32> to vector<8x8x4xf32>
    %65 = arith.addf %61, %64 : vector<8x8x4xf32>
    %cst_33 = arith.constant dense<0.000000e+00> : vector<8x8x8xf32>
    %66 = tpu.matmul %45, %55, %cst_33 {dimension_numbers = #tpu.dot_dimension_numbers<[2], [2], [1], [1], [0, 0, 0, 1, 1, 1], [0], [0]>} : vector<8x8x4xf32>, vector<8x8x4xf32>, vector<8x8x8xf32> -> vector<8x8x8xf32>
    %cst_34 = arith.constant dense<0xFF800000> : vector<8x8xf32>
    %67 = vector.multi_reduction <maximumf>, %66, %cst_34 [2] : vector<8x8x8xf32> to vector<8x8xf32>
    %68 = vector.shape_cast %67 : vector<8x8xf32> to vector<8x8x1xf32>
    %69 = vector.broadcast %68 : vector<8x8x1xf32> to vector<8x8x8xf32>
    %70 = arith.subf %66, %69 : vector<8x8x8xf32>
    %71 = math.exp %70 : vector<8x8x8xf32>
    %cst_35 = arith.constant dense<0.000000e+00> : vector<8x8xf32>
    %72 = vector.multi_reduction <add>, %71, %cst_35 [2] : vector<8x8x8xf32> to vector<8x8xf32>
    %73 = vector.shape_cast %72 : vector<8x8xf32> to vector<8x8x1xf32>
    %74 = tpu.reciprocal %73 {approx = true} : vector<8x8x1xf32> -> vector<8x8x1xf32>
    %75 = vector.broadcast %74 : vector<8x8x1xf32> to vector<8x8x8xf32>
    %76 = arith.mulf %71, %75 : vector<8x8x8xf32>
    %cst_36 = arith.constant dense<0.000000e+00> : vector<8x8x4xf32>
    %77 = tpu.matmul %76, %65, %cst_36 {dimension_numbers = #tpu.dot_dimension_numbers<[2], [1], [1], [2], [0, 0, 0, 1, 1, 2], [0], [0]>} : vector<8x8x8xf32>, vector<8x8x4xf32>, vector<8x8x4xf32> -> vector<8x8x4xf32>
    %c0_37 = arith.constant 0 : index
    %c0_38 = arith.constant 0 : index
    %c0_39 = arith.constant 0 : index
    %78 = vector.load %arg11[%c0_37, %c0_38, %c0_39] : memref<8x4x32xf32, #tpu.memory_space<vmem>>, vector<8x4x32xf32>
    %cst_40 = arith.constant dense<0.000000e+00> : vector<8x8x32xf32>
    %79 = tpu.matmul %77, %78, %cst_40 {dimension_numbers = #tpu.dot_dimension_numbers<[2], [1], [1], [2], [0, 0, 0, 1, 1, 2], [0], [0]>} : vector<8x8x4xf32>, vector<8x4x32xf32>, vector<8x8x32xf32> -> vector<8x8x32xf32>
    %cst_41 = arith.constant dense<0.000000e+00> : vector<8x32xf32>
    %80 = vector.multi_reduction <add>, %79, %cst_41 [0] : vector<8x8x32xf32> to vector<8x32xf32>
    %81 = vector.broadcast %12 : vector<1x32xf32> to vector<8x32xf32>
    %82 = arith.addf %80, %81 : vector<8x32xf32>
    %cst_42 = arith.constant dense<0.000000e+00> : vector<8x32xf32>
    %83 = tpu.matmul %82, %28, %cst_42 {dimension_numbers = #tpu.dot_dimension_numbers<[1], [0], [0], [1], [0, 0, 1, 1], [], []>} : vector<8x32xf32>, vector<32x32xf32>, vector<8x32xf32> -> vector<8x32xf32>
    %cst_43 = arith.constant dense<0.000000e+00> : vector<8x32xf32>
    %84 = tpu.matmul %1, %29, %cst_43 {dimension_numbers = #tpu.dot_dimension_numbers<[1], [0], [0], [1], [0, 0, 1, 1], [], []>} : vector<8x32xf32>, vector<32x32xf32>, vector<8x32xf32> -> vector<8x32xf32>
    %85 = arith.addf %83, %84 : vector<8x32xf32>
    %86 = vector.broadcast %13 : vector<1x32xf32> to vector<8x32xf32>
    %87 = arith.addf %85, %86 : vector<8x32xf32>
    %88 = arith.negf %87 : vector<8x32xf32>
    %89 = math.exp %88 : vector<8x32xf32>
    %cst_44 = arith.constant 1.000000e+00 : f32
    %90 = vector.broadcast %cst_44 : f32 to vector<8x32xf32>
    %91 = arith.addf %90, %89 : vector<8x32xf32>
    %92 = arith.divf %90, %91 : vector<8x32xf32>
    %93 = arith.mulf %92, %82 : vector<8x32xf32>
    %cst_45 = arith.constant 1.000000e+00 : f32
    %94 = vector.broadcast %cst_45 : f32 to vector<8x32xf32>
    %95 = arith.subf %94, %92 : vector<8x32xf32>
    %96 = arith.mulf %95, %1 : vector<8x32xf32>
    %97 = arith.addf %93, %96 : vector<8x32xf32>
    %98 = vector.shape_cast %76 : vector<8x8x8xf32> to vector<8x1x8x8xf32>
    %cst_46 = arith.constant dense<0.000000e+00> : vector<1x8x8xf32>
    %99 = vector.multi_reduction <add>, %98, %cst_46 [0] : vector<8x1x8x8xf32> to vector<1x8x8xf32>
    %cst_47 = arith.constant 8.000000e+00 : f32
    %100 = vector.broadcast %cst_47 : f32 to vector<1x8x8xf32>
    %101 = arith.divf %99, %100 : vector<1x8x8xf32>
    %c0_48 = arith.constant 0 : index
    %c0_49 = arith.constant 0 : index
    %c0_50 = arith.constant 0 : index
    %102 = vector.load %arg5[%c0_48, %c0_49, %c0_50] : memref<1x8x8xf32, #tpu.memory_space<vmem>>, vector<1x8x8xf32>
    %103 = arith.mulf %101, %102 : vector<1x8x8xf32>
    %104 = vector.shape_cast %97 : vector<8x32xf32> to vector<1x8x32xf32>
    %c0_51 = arith.constant 0 : index
    %c0_52 = arith.constant 0 : index
    %c0_53 = arith.constant 0 : index
    %105 = vector.load %arg13[%c0_51, %c0_52, %c0_53] : memref<1x8x32xf32, #tpu.memory_space<vmem>>, vector<1x8x32xf32>
    tpu.vector_store %arg13[%c0_51, %c0_52, %c0_53], %104 {strides = array<i32>} : memref<1x8x32xf32, #tpu.memory_space<vmem>>, vector<1x8x32xf32>,
    %c0_54 = arith.constant 0 : index
    %c0_55 = arith.constant 0 : index
    %c0_56 = arith.constant 0 : index
    %106 = vector.load %arg14[%c0_54, %c0_55, %c0_56] : memref<1x8x8xf32, #tpu.memory_space<vmem>>, vector<1x8x8xf32>
    tpu.vector_store %arg14[%c0_54, %c0_55, %c0_56], %103 {strides = array<i32>} : memref<1x8x8xf32, #tpu.memory_space<vmem>>, vector<1x8x8xf32>,
    return
  }
  func.func @transform_0(%arg0: i32) -> (i32, i32, i32) {
    %c0_i32 = arith.constant 0 : i32
    %c0_i32_0 = arith.constant 0 : i32
    %c0_i32_1 = arith.constant 0 : i32
    return %arg0, %c0_i32, %c0_i32_0 : i32, i32, i32
  }
  func.func @transform_1(%arg0: i32) -> (i32, i32, i32) {
    %c0_i32 = arith.constant 0 : i32
    %c0_i32_0 = arith.constant 0 : i32
    %c0_i32_1 = arith.constant 0 : i32
    return %arg0, %c0_i32, %c0_i32_0 : i32, i32, i32
  }
  func.func @transform_2(%arg0: i32) -> (i32, i32, i32) {
    %c0_i32 = arith.constant 0 : i32
    %c0_i32_0 = arith.constant 0 : i32
    %c0_i32_1 = arith.constant 0 : i32
    return %arg0, %c0_i32, %c0_i32_0 : i32, i32, i32
  }
  func.func @transform_3(%arg0: i32) -> (i32, i32, i32) {
    %c0_i32 = arith.constant 0 : i32
    %c0_i32_0 = arith.constant 0 : i32
    %c0_i32_1 = arith.constant 0 : i32
    return %arg0, %c0_i32, %c0_i32_0 : i32, i32, i32
  }
  func.func @transform_4(%arg0: i32) -> (i32, i32, i32) {
    %c0_i32 = arith.constant 0 : i32
    %c0_i32_0 = arith.constant 0 : i32
    %c0_i32_1 = arith.constant 0 : i32
    return %arg0, %c0_i32, %c0_i32_0 : i32, i32, i32
  }
  func.func @transform_5(%arg0: i32) -> (i32, i32) {
    %c0_i32 = arith.constant 0 : i32
    %c0_i32_0 = arith.constant 0 : i32
    %c0_i32_1 = arith.constant 0 : i32
    return %c0_i32, %c0_i32_0 : i32, i32
  }
  func.func @transform_6(%arg0: i32) -> (i32, i32) {
    %c0_i32 = arith.constant 0 : i32
    %c0_i32_0 = arith.constant 0 : i32
    %c0_i32_1 = arith.constant 0 : i32
    return %c0_i32, %c0_i32_0 : i32, i32
  }
  func.func @transform_7(%arg0: i32) -> (i32, i32) {
    %c0_i32 = arith.constant 0 : i32
    %c0_i32_0 = arith.constant 0 : i32
    %c0_i32_1 = arith.constant 0 : i32
    return %c0_i32, %c0_i32_0 : i32, i32
  }
  func.func @transform_8(%arg0: i32) -> (i32, i32, i32, i32) {
    %c0_i32 = arith.constant 0 : i32
    %c0_i32_0 = arith.constant 0 : i32
    %c0_i32_1 = arith.constant 0 : i32
    %c0_i32_2 = arith.constant 0 : i32
    %c0_i32_3 = arith.constant 0 : i32
    return %c0_i32, %c0_i32_0, %c0_i32_1, %c0_i32_2 : i32, i32, i32, i32
  }
  func.func @transform_9(%arg0: i32) -> (i32, i32, i32, i32) {
    %c0_i32 = arith.constant 0 : i32
    %c0_i32_0 = arith.constant 0 : i32
    %c0_i32_1 = arith.constant 0 : i32
    %c0_i32_2 = arith.constant 0 : i32
    %c0_i32_3 = arith.constant 0 : i32
    return %c0_i32, %c0_i32_0, %c0_i32_1, %c0_i32_2 : i32, i32, i32, i32
  }
  func.func @transform_10(%arg0: i32) -> (i32, i32, i32) {
    %c0_i32 = arith.constant 0 : i32
    %c0_i32_0 = arith.constant 0 : i32
    %c0_i32_1 = arith.constant 0 : i32
    %c0_i32_2 = arith.constant 0 : i32
    return %c0_i32, %c0_i32_0, %c0_i32_1 : i32, i32, i32
  }
  func.func @transform_11(%arg0: i32) -> (i32, i32) {
    %c0_i32 = arith.constant 0 : i32
    %c0_i32_0 = arith.constant 0 : i32
    %c0_i32_1 = arith.constant 0 : i32
    return %c0_i32, %c0_i32_0 : i32, i32
  }
  func.func @transform_12(%arg0: i32) -> (i32, i32, i32) {
    %c0_i32 = arith.constant 0 : i32
    %c0_i32_0 = arith.constant 0 : i32
    %c0_i32_1 = arith.constant 0 : i32
    return %arg0, %c0_i32, %c0_i32_0 : i32, i32, i32
  }
  func.func @transform_13(%arg0: i32) -> (i32, i32, i32) {
    %c0_i32 = arith.constant 0 : i32
    %c0_i32_0 = arith.constant 0 : i32
    %c0_i32_1 = arith.constant 0 : i32
    return %arg0, %c0_i32, %c0_i32_0 : i32, i32, i32
  }
}

</mosaic_0001>

<bundles_post_ra>
// kernel: tpu_custom_call.1
= control target key start
LH: loop header
LB: loop body
LE: loop exit
PB: predicated region body
PF: predicated region fallthrough
CT: control target
= control target key end

     0   :  { %s7168_s0 = inlined_call_operand.vmem [shape: f32[2,8,32], index: 0, kind: input, shape index: {}]   ;;  %s7169_s1 = inlined_call_operand.vmem [shape: f32[2,8,32], index: 1, kind: input, shape index: {}]   ;;  %s7170_s2 = inlined_call_operand.vmem [shape: f32[2,8,32], index: 2, kind: input, shape index: {}]   ;;  %s7171_s3 = inlined_call_operand.vmem [shape: f32[2,8,3], index: 3, kind: input, shape index: {}]   ;;  %s7172_s4 = inlined_call_operand.vmem [shape: f32[2,8,8], index: 4, kind: input, shape index: {}]   ;;  %s7173_s5 = inlined_call_operand.vmem [shape: f32[3,8], index: 5, kind: input, shape index: {}]   ;;  %s7174_s6 = inlined_call_operand.vmem [shape: f32[8,32], index: 6, kind: input, shape index: {}]   ;;  %s7175_s7 = inlined_call_operand.vmem [shape: f32[32,96], index: 7, kind: input, shape index: {}]   ;;  %s7176_s8 = inlined_call_operand.vmem [shape: f32[3,8,32,4], index: 8, kind: input, shape index: {}]   ;;  %s7177_s9 = inlined_call_operand.vmem [shape: f32[3,8,1,4], index: 9, kind: input, shape index: {}]   ;;  %s7178_s10 = inlined_call_operand.vmem [shape: f32[8,4,32], index: 10, kind: input, shape index: {}]   ;;  %s7179_s11 = inlined_call_operand.vmem [shape: f32[5,32], index: 11, kind: input, shape index: {}]   ;;  %s7180_s12 = inlined_call_operand.hbm [shape: f32[2,8,32], index: 12, kind: output, shape index: {0}]   ;;  %s7181_s13 = inlined_call_operand.hbm [shape: f32[2,8,8], index: 13, kind: output, shape index: {1}]  }
   0x1   :  { %7184 = sst [smem:[#allocation10_spill]] %s7171_s3 }
   0x2   :  { %7185 = sst [smem:[#allocation11_spill]] %s7173_s5 }
   0x3   :  { %7186 = sst [smem:[#allocation12_spill]] %s7174_s6 }
   0x4   :  { %19 = vsyncpa [#allocation3], 0 }
   0x5   :  { %21 = vsyncpa [#allocation3 + $0x1], 0 }
   0x6   :  { %22 = vsyncpa [#allocation5], 0 }
   0x7   :  { %24 = vsyncpa [#allocation5 + $0x1], 0  ;;  %s6194_s25 = smov 0   ;;  %s6196_s26 = smov 0  }
   0x8   :  { %s6198_s27 = smov 0   ;;  %s6200_s28 = smov 0  }
   0x9 LB: > { %7187 = sst [smem:[#allocation8_spill]] %s6111_s27  ;;  %s6215_s29 = sadd.s32 4294967295, %s6115_s28   ;;  %s6115_s28 = sphi %s6200_s28, %s7199_s28   ;;  %s6111_s27 = sphi %s6198_s27, %s7196_s27   ;;  %s6107_s26 = sphi %s6196_s26, %s7198_s26   ;;  %s6103_s25 = sphi %s6194_s25, %s7197_s25  }
   0xa   : > { %s5020_s30 = sadd.s32 4294967294, %s6115_s28   ;;  %s6219_s14 = sadd.s32 1, %s6115_s28  }
   0xb   : > { %s314_s15 = sadd.s32 1, %s6111_s27  ;;  %s311_s16 = ssub.s32 %s6115_s28, %s6219_s14 }
   0xc   : > { %p324_p0 = scmp.ne.s32.totalorder %s6111_s27, %s6107_s26  ;;  %p312_p1 = scmp.eq.s32.totalorder %s311_s16, 0 }
   0xd   : > { %p325_p2 = scmp.eq.s32.totalorder %s6215_s29, 1  ;;  %p330_p3 = scmp.ne.s32.totalorder %s6107_s26, %s6103_s25 }
   0xe   : > { %p331_p4 = scmp.eq.s32.totalorder %s5020_s30, 1  ;;  %p5023_p7 = scmp.ge.s32.totalorder %s6115_s28, 1 }
   0xf   : > { %s6230_s17 = scalar_select %p312_p1, %s6111_s27, %s314_s15  }
  0x10   : > { %p6232_p5 = por %p325_p2, %p324_p0  ;;  %p6236_p6 = por %p331_p4, %p330_p3 }
  0x11   : > { %7188 = sst [smem:[#allocation9_spill]] %s6230_s17  ;;  %p431_p8 = scmp.lt.s32.totalorder %s6115_s28, 3 }
  0x13   : > { %p432_p9 = pnand %p5023_p7, %p431_p8 }
  0x14   : > { %s7191_s5 = sld [smem:[#allocation11_spill]] (!%p432_p9)  ;;  %vm529_vm0 = vcmask (!%p432_p9), 1042432   ;;  %p495_p10 = scmp.lt.s32.totalorder (!%p432_p9), %s6215_s29, 1  ;;  %v6117_v1 = vmov (!%p432_p9), 0.0   ;;  %vm6118_vm1 = vmmov (!%p432_p9), 0   ;;  %vm525_vm2 = vcmask (!%p432_p9), 23552  }
  0x15   : > { %435 = sbr.rel (%p432_p9) target bundleno = 2150 (0x866), region = 68  ;;  %5319 = vmatprep.subr.mxu0 (!%p432_p9), %v6117_v1  ;;  %5321 = vmatprep.mubr.msk.f32.mxu0 (!%p432_p9), %vm6118_vm1, %v6117_v1  ;;  %s7192_s3 = sld [smem:[#allocation10_spill]] (!%p432_p9)  ;;  %v685_v4 = vld [vmem:[%s7175_s7] sm:$0xff] (!%p432_p9)  ;;  %v686_v5 = vld [vmem:[%s7175_s7 + $0x8] sm:$0xff] (!%p432_p9)  ;;  %v6119_v6 = vmov (!%p432_p9), 0.0|0.0   ;;  %v521_v8 = vlaneseq (!%p432_p9)  ;;  %vm609_vm3 = vcmask (!%p432_p9), 64512  }
  0x16   : > { %5324 = vmatprep.subr.mxu1 (!%p432_p9), %v6117_v1  ;;  %5326 = vmatprep.mubr.msk.f32.mxu1 (!%p432_p9), %vm6118_vm1, %v6117_v1  ;;  %s7193_s6 = sld [smem:[#allocation12_spill]] (!%p432_p9)  ;;  %v5747_v7 = vpack.c.bf16 (!%p432_p9), %v686_v5, %v685_v4  ;;  %v6279_v11 = vld [vmem:[%s7179_s11] sm:$0x1f] (!%p432_p9)  ;;  %v769_v14 = vld [vmem:[%s7176_s8 + $0x8] sm:$0xff] (!%p432_p9)  ;;  %v687_v20 = vld [vmem:[%s7175_s7 + $0x10] sm:$0xff] (!%p432_p9)  ;;  %vm693_vm4 = vcmask (!%p432_p9), 261120  }
  0x17   : > { %v6273_v9 = vshrl.u32 (!%p432_p9), %v521_v8, 7  ;;  %v768_v13 = vld [vmem:[%s7176_s8] sm:$0xff] (!%p432_p9)  ;;  %v688_v21 = vld [vmem:[%s7175_s7 + $0x18] sm:$0xff] (!%p432_p9)  ;;  %v770_v22 = vld [vmem:[%s7176_s8 + $0x10] sm:$0xff] (!%p432_p9)  ;;  %vm2721_vm5 = vcmask (!%p432_p9), 31744   ;;  %s6972_s30 = sand.u32 (!%p432_p9), 1, %s6107_s26  }
  0x18   : > { %v5753_v18 = vpack.c.bf16 (!%p432_p9), %v769_v14, %v768_v13  ;;  %v5750_v23 = vpack.c.bf16 (!%p432_p9), %v688_v21, %v687_v20  ;;  %v771_v24 = vld [vmem:[%s7176_s8 + $0x18] sm:$0xff] (!%p432_p9)  ;;  %v772_v28 = vld [vmem:[%s7176_s8 + $0x20] sm:$0xff] (!%p432_p9)  ;;  %v773_v29 = vld [vmem:[%s7176_s8 + $0x28] sm:$0xff] (!%p432_p9)  ;;  %vm4013_vm6 = vcmask (!%p432_p9), 1043456   ;;  %s5128_s20 = sshll.u32 (!%p432_p9), %s6215_s29, 7  ;;  %s6122_s17 = smov (!%p432_p9), [#allocation4]  }
  0x19   : > { %v523_v10 = vsub.s32 (!%p432_p9), 0, %v6273_v9  ;;  %v5756_v25 = vpack.c.bf16 (!%p432_p9), %v771_v24, %v770_v22  ;;  %v607_v26 = vsub.s32 (!%p432_p9), 1, %v6273_v9  ;;  %v776_v30 = vld [vmem:[%s7176_s8 + $0x40] sm:$0xff] (!%p432_p9)  ;;  %v777_v31 = vld [vmem:[%s7176_s8 + $0x48] sm:$0xff] (!%p432_p9)  ;;  %v5759_v37 = vpack.c.bf16 (!%p432_p9), %v773_v29, %v772_v28  ;;  %v774_v39 = vld [vmem:[%s7176_s8 + $0x30] sm:$0xff] (!%p432_p9) }
  0x1a   : > { %v520_v0 = vld [vmem:[%s7191_s5] sm:$0x7] (!%p432_p9)  ;;  %v5765_v38 = vpack.c.bf16 (!%p432_p9), %v777_v31, %v776_v30  ;;  %v775_v42 = vld [vmem:[%s7176_s8 + $0x38] sm:$0xff] (!%p432_p9)  ;;  %v778_v43 = vld [vmem:[%s7176_s8 + $0x50] sm:$0xff] (!%p432_p9)  ;;  %v691_v29 = vsub.s32 (!%p432_p9), 2, %v6273_v9 }
  0x1b   : > { %5320 = vmatpush3.msk.msra.mxu0 (!%p432_p9), %vm529_vm0, %v520_v0  ;;  %v524_v12 = vrot.slane (!%p432_p9), %v6279_v11, %v523_v10  ;;  %v608_v27 = vrot.slane (!%p432_p9), %v6279_v11, %v607_v26  ;;  %v779_v44 = vld [vmem:[%s7176_s8 + $0x58] sm:$0xff] (!%p432_p9)  ;;  %v5762_v45 = vpack.c.bf16 (!%p432_p9), %v775_v42, %v774_v39  ;;  %v780_v47 = vld [vmem:[%s7176_s8 + $0x60] sm:$0xff] (!%p432_p9)  ;;  %v781_v48 = vld [vmem:[%s7176_s8 + $0x68] sm:$0xff] (!%p432_p9) }
  0x1c   : > { %s496_s22 = scalar_select %p495_p10, %s6215_s29, 1  ;;  %v604_v3 = vld [vmem:[%s7193_s6] sm:$0xff]  ;;  %5746 = vmatprep.subr.bf16.mxu0 %v6119_v6  ;;  %v5768_v46 = vpack.c.bf16 %v779_v44, %v778_v43  ;;  %v785_v50 = vld [vmem:[%s7176_s8 + $0x88] sm:$0xff]  ;;  %v5771_v51 = vpack.c.bf16 %v781_v48, %v780_v47  ;;  %v782_v53 = vld [vmem:[%s7176_s8 + $0x70] sm:$0xff]  ;;  %v692_v30 = vrot.slane %v6279_v11, %v691_v29 }
  0x1d   : > { %5325 = vmatpush3.msra.mxu1 %v604_v3  ;;  %v784_v49 = vld [vmem:[%s7176_s8 + $0x80] sm:$0xff]  ;;  %v783_v54 = vld [vmem:[%s7176_s8 + $0x78] sm:$0xff]  ;;  %v786_v55 = vld [vmem:[%s7176_s8 + $0x90] sm:$0xff] }
  0x1e   : > { %s6253_s23 = sshll.u32 %s496_s22, 3  ;;  %5752 = vmatprep.subr.bf16.mxu1 %v6119_v6  ;;  %v5777_v52 = vpack.c.bf16 %v785_v50, %v784_v49  ;;  %v787_v56 = vld [vmem:[%s7176_s8 + $0x98] sm:$0xff]  ;;  %v5774_v57 = vpack.c.bf16 %v783_v54, %v782_v53  ;;  %v788_v59 = vld [vmem:[%s7176_s8 + $0xa0] sm:$0xff]  ;;  %v789_v60 = vld [vmem:[%s7176_s8 + $0xa8] sm:$0xff] }
  0x1f   : > { %s510_s15 = scalar_lea.vmem %s7192_s3, %s6253_s23  ;;  %s6311_s21 = scalar_lea.vmem %s7168_s0, %s6253_s23  ;;  %v5780_v58 = vpack.c.bf16 %v787_v56, %v786_v55  ;;  %v792_v61 = vld [vmem:[%s7176_s8 + $0xc0] sm:$0xff]  ;;  %v793_v62 = vld [vmem:[%s7176_s8 + $0xc8] sm:$0xff]  ;;  %v5783_v63 = vpack.c.bf16 %v789_v60, %v788_v59  ;;  %v791_v3 = vld [vmem:[%s7176_s8 + $0xb8] sm:$0xff] }
  0x20   : > { %v518_v2 = vld [vmem:[%s510_s15] sm:$0xff]  ;;  %s502_s24 = scalar_lea.vmem %s7169_s1, %s6253_s23  ;;  %v5789_v0 = vpack.c.bf16 %v793_v62, %v792_v61  ;;  %v794_v4 = vld [vmem:[%s7176_s8 + $0xd0] sm:$0xff]  ;;  %v795_v5 = vld [vmem:[%s7176_s8 + $0xd8] sm:$0xff]  ;;  %s506_s16 = scalar_lea.vmem %s7170_s2, %s6253_s23 }
  0x21   : > { %5322 = vmatmul.mubr.msk.f32.vlgmr.msra.gmra.mrb[0].mxu0 %vm525_vm2, %v518_v2  ;;  %v515_v32 = vld [vmem:[%s6311_s21] sm:$0xff]  ;;  %v790_v2 = vld [vmem:[%s7176_s8 + $0xb0] sm:$0xff]  ;;  %v5792_v8 = vpack.c.bf16 %v795_v5, %v794_v4  ;;  %v805_v21 = vld [vmem:[%s7176_s8 + $0x128] sm:$0xff]  ;;  %s514_s22 = scalar_lea.vmem %s7172_s4, %s6253_s23  ;;  %s6121_s3 = smov 64  }
  0x22   : > { %5337 = vmatprep.mubr.msk.f32.mxu0 %vm6118_vm1, %v6117_v1  ;;  %5748 = vmatpush3.bf16.msra.mxu0 %v5747_v7  ;;  %v516_v33 = vld [vmem:[%s502_s24] sm:$0xff]  ;;  %v5786_v7 = vpack.c.bf16 %v791_v3, %v790_v2  ;;  %v798_v14 = vld [vmem:[%s7176_s8 + $0xf0] sm:$0xff]  ;;  %v803_v24 = vld [vmem:[%s7176_s8 + $0x118] sm:$0xff]  ;;  %s4855_s23 = scalar_lea.sflag [#allocation5], %s6972_s30  ;;  %s6025_s24 = sshll.u32 %s6122_s17, 4  ;;  %s6026_s24 = int_to_ptr.vmem [resolvable:$false] %s6025_s24 }
  0x23   : > { %5749 = vmatprep.subr.bf16.mxu0 %v6119_v6  ;;  %v796_v10 = vld [vmem:[%s7176_s8 + $0xe0] sm:$0xff]  ;;  %v806_v26 = vld [vmem:[%s7176_s8 + $0x130] sm:$0xff]  ;;  %v809_v39 = vld [vmem:[%s7176_s8 + $0x148] sm:$0xff] }
  0x24   : > { %v812_v11 = vld [vmem:[%s7176_s8 + $0x160] sm:$0xff]  ;;  %v814_v47 = vld [vmem:[%s7176_s8 + $0x170] sm:$0xff]  ;;  %v815_v48 = vld [vmem:[%s7176_s8 + $0x178] sm:$0xff] }
  0x25   : > { %v817_v55 = vld [vmem:[%s7176_s8 + $0x188] sm:$0xff]  ;;  %v820_v56 = vld [vmem:[%s7176_s8 + $0x1a0] sm:$0xff]  ;;  %v818_v62 = vld [vmem:[%s7176_s8 + $0x190] sm:$0xff] }
  0x26   : > { %5751 = vmatpush3.bf16.msra.mxu0 %v5750_v23  ;;  %v802_v23 = vld [vmem:[%s7176_s8 + $0x110] sm:$0xff]  ;;  %v823_v2 = vld [vmem:[%s7176_s8 + $0x1b8] sm:$0xff]  ;;  %v824_v5 = vld [vmem:[%s7176_s8 + $0x1c0] sm:$0xff] }
  0x27   : > { %5758 = vmatprep.subr.bf16.mxu0 %v6119_v6  ;;  %v837_v29 = vld [vmem:[%s7176_s8 + $0x228] sm:$0xff] }
  0xf4   : > { %v599_v15 = vpop.f32.mrb[0].mxu0 }
  0xf5   : > { %v600_v16 = vadd.f32 %v599_v15, %v524_v12  ;;  %v5323_v17 = vpop.f32.mrb[1].mxu0  ;;  %v797_v12 = vld [vmem:[%s7176_s8 + $0xe8] sm:$0xff]  ;;  %v799_v15 = vld [vmem:[%s7176_s8 + $0xf8] sm:$0xff] }
  0xf6   : > { %v5795_v13 = vpack.c.bf16 %v797_v12, %v796_v10  ;;  %v800_v17 = vld [vmem:[%s7176_s8 + $0x100] sm:$0xff]  ;;  %v825_v10 = vld [vmem:[%s7176_s8 + $0x1c8] sm:$0xff] }
  0xf7   : > { %v603_v19 = vmax.f32 %v600_v16, 0.0  ;;  %v5798_v16 = vpack.c.bf16 %v799_v15, %v798_v14  ;;  %v828_v12 = vld [vmem:[%s7176_s8 + $0x1e0] sm:$0xff] }
  0xf9   : > { %5327 = vmatmul.mubr.msk.f32.vlgmr.msra.gmra.mrb[0].mxu1 %vm609_vm3, %v603_v19  ;;  %v804_v19 = vld [vmem:[%s7176_s8 + $0x120] sm:$0xff] }
  0xfa   : > { %5754 = vmatpush3.bf16.msra.mxu1 %v5753_v18  ;;  %5348 = vmatprep.mubr.msk.f32.mxu1 %vm6118_vm1, %v6117_v1  ;;  %v801_v18 = vld [vmem:[%s7176_s8 + $0x108] sm:$0xff]  ;;  %v5807_v22 = vpack.c.bf16 %v805_v21, %v804_v19  ;;  %v827_v19 = vld [vmem:[%s7176_s8 + $0x1d8] sm:$0xff] }
  0xfb   : > { %5755 = vmatprep.subr.bf16.mxu1 %v6119_v6  ;;  %v5801_v20 = vpack.c.bf16 %v801_v18, %v800_v17  ;;  %v826_v18 = vld [vmem:[%s7176_s8 + $0x1d0] sm:$0xff]  ;;  %v831_v21 = vld [vmem:[%s7176_s8 + $0x1f8] sm:$0xff] }
  0xfe   : > { %5757 = vmatpush3.bf16.msra.mxu1 %v5756_v25  ;;  %v5804_v25 = vpack.c.bf16 %v803_v24, %v802_v23 }
  0xff   : > { %5764 = vmatprep.subr.bf16.mxu1 %v6119_v6 }
 0x1cc   : > { %v679_v34 = vpop.f32.mrb[0].mxu1 }
 0x1cd   : > { %v680_v35 = vadd.f32 %v679_v34, %v608_v27  ;;  %v5328_v36 = vpop.f32.mrb[1].mxu1  ;;  %v807_v27 = vld [vmem:[%s7176_s8 + $0x138] sm:$0xff] }
 0x1ce   : > { %v5810_v28 = vpack.c.bf16 %v807_v27, %v806_v26  ;;  %v808_v36 = vld [vmem:[%s7176_s8 + $0x140] sm:$0xff]  ;;  %v833_v26 = vld [vmem:[%s7176_s8 + $0x208] sm:$0xff] }
 0x1cf   : > { %v6334_v40 = vadd.f32 %v680_v35, %v515_v32  ;;  %v684_v41 = vadd.f32 %v680_v35, %v516_v33  ;;  %v5813_v43 = vpack.c.bf16 %v809_v39, %v808_v36  ;;  %v839_v36 = vld [vmem:[%s7176_s8 + $0x238] sm:$0xff] }
 0x1d1   : > { %5338 = vmatmul.mubr.msk.f32.vlgmr.msra.gmra.mrb[2].mxu0 %vm693_vm4, %v684_v41  ;;  %5349 = vmatmul.mubr.msk.f32.vlgmr.msra.gmra.mrb[2].mxu1 %vm693_vm4, %v6334_v40 }
 0x1d2   : > { %5760 = vmatpush3.bf16.msra.mxu0 %v5759_v37  ;;  %5766 = vmatpush3.bf16.msra.mxu1 %v5765_v38 }
 0x1d3   : > { %5761 = vmatprep.subr.bf16.mxu0 %v6119_v6  ;;  %5767 = vmatprep.subr.bf16.mxu1 %v6119_v6 }
 0x1d4   : > { %5359 = vmatprep.mubr.msk.f32.mxu0 %vm6118_vm1, %v6117_v1  ;;  %5370 = vmatprep.mubr.msk.f32.mxu1 %vm6118_vm1, %v6117_v1 }
 0x1d6   : > { %5763 = vmatpush3.bf16.msra.mxu0 %v5762_v45  ;;  %5769 = vmatpush3.bf16.msra.mxu1 %v5768_v46  ;;  %v810_v45 = vld [vmem:[%s7176_s8 + $0x150] sm:$0xff]  ;;  %v811_v46 = vld [vmem:[%s7176_s8 + $0x158] sm:$0xff] }
 0x1d7   : > { %5770 = vmatprep.subr.bf16.mxu0 %v6119_v6  ;;  %5776 = vmatprep.subr.bf16.mxu1 %v6119_v6  ;;  %v5816_v50 = vpack.c.bf16 %v811_v46, %v810_v45  ;;  %v842_v46 = vld [vmem:[%s7176_s8 + $0x250] sm:$0xff] }
 0x1d9   : > { %5360 = vmatmul.mubr.msk.f32.vlgmr.msra.gmra.mrb[4].mxu0 %vm693_vm4, %v6334_v40  ;;  %5371 = vmatmul.mubr.msk.f32.vlgmr.msra.gmra.mrb[4].mxu1 %vm693_vm4, %v6334_v40 }
 0x1da   : > { %5772 = vmatpush3.bf16.msra.mxu0 %v5771_v51  ;;  %5778 = vmatpush3.bf16.msra.mxu1 %v5777_v52  ;;  %v5822_v51 = vpack.c.bf16 %v815_v48, %v814_v47  ;;  %v816_v52 = vld [vmem:[%s7176_s8 + $0x180] sm:$0xff]  ;;  %v843_v47 = vld [vmem:[%s7176_s8 + $0x258] sm:$0xff] }
 0x1db   : > { %5773 = vmatprep.subr.bf16.mxu0 %v6119_v6  ;;  %5779 = vmatprep.subr.bf16.mxu1 %v6119_v6  ;;  %v5825_v60 = vpack.c.bf16 %v817_v55, %v816_v52  ;;  %v848_v52 = vld [vmem:[%s7176_s8 + $0x280] sm:$0xff]  ;;  %v849_v55 = vld [vmem:[%s7176_s8 + $0x288] sm:$0xff] }
 0x1dc   : > { %5381 = vmatprep.mubr.msk.f32.mxu0 %vm6118_vm1, %v6117_v1  ;;  %5392 = vmatprep.mubr.msk.f32.mxu1 %vm6118_vm1, %v6117_v1 }
 0x1de   : > { %5775 = vmatpush3.bf16.msra.mxu0 %v5774_v57  ;;  %5781 = vmatpush3.bf16.msra.mxu1 %v5780_v58  ;;  %v821_v57 = vld [vmem:[%s7176_s8 + $0x1a8] sm:$0xff] }
 0x1df   : > { %5782 = vmatprep.subr.bf16.mxu0 %v6119_v6  ;;  %5788 = vmatprep.subr.bf16.mxu1 %v6119_v6  ;;  %v5831_v61 = vpack.c.bf16 %v821_v57, %v820_v56  ;;  %v852_v57 = vld [vmem:[%s7176_s8 + $0x2a0] sm:$0xff] }
 0x1e1   : > { %5382 = vmatmul.mubr.msk.f32.vlgmr.msra.gmra.mrb[6].mxu0 %vm693_vm4, %v6334_v40  ;;  %5393 = vmatmul.mubr.msk.f32.vlgmr.msra.gmra.mrb[6].mxu1 %vm693_vm4, %v6334_v40 }
 0x1e2   : > { %5784 = vmatpush3.bf16.msra.mxu0 %v5783_v63  ;;  %5790 = vmatpush3.bf16.msra.mxu1 %v5789_v0  ;;  %v819_v63 = vld [vmem:[%s7176_s8 + $0x198] sm:$0xff]  ;;  %v822_v0 = vld [vmem:[%s7176_s8 + $0x1b0] sm:$0xff] }
 0x1e3   : > { %5785 = vmatprep.subr.bf16.mxu0 %v6119_v6  ;;  %5791 = vmatprep.subr.bf16.mxu1 %v6119_v6  ;;  %v5828_v3 = vpack.c.bf16 %v819_v63, %v818_v62  ;;  %v5834_v4 = vpack.c.bf16 %v823_v2, %v822_v0  ;;  %v854_v63 = vld [vmem:[%s7176_s8 + $0x2b0] sm:$0xff]  ;;  %v855_v0 = vld [vmem:[%s7176_s8 + $0x2b8] sm:$0xff] }
 0x1e4   : > { %5403 = vmatprep.mubr.msk.f32.mxu0 %vm6118_vm1, %v6117_v1  ;;  %5414 = vmatprep.mubr.msk.f32.mxu1 %vm6118_vm1, %v6117_v1 }
 0x1e6   : > { %5787 = vmatpush3.bf16.msra.mxu0 %v5786_v7  ;;  %5793 = vmatpush3.bf16.msra.mxu1 %v5792_v8 }
 0x1e7   : > { %5794 = vmatprep.subr.bf16.mxu0 %v6119_v6  ;;  %5800 = vmatprep.subr.bf16.mxu1 %v6119_v6 }
 0x1e9   : > { %5404 = vmatmul.mubr.msk.f32.vlgmr.msra.gmra.mrb[8].mxu0 %vm693_vm4, %v6334_v40  ;;  %5415 = vmatmul.mubr.msk.f32.vlgmr.msra.gmra.mrb[8].mxu1 %vm693_vm4, %v6334_v40 }
 0x1ea   : > { %5796 = vmatpush3.bf16.msra.mxu0 %v5795_v13  ;;  %5425 = vmatprep.mubr.msk.f32.mxu0 %vm6118_vm1, %v6117_v1  ;;  %v829_v13 = vld [vmem:[%s7176_s8 + $0x1e8] sm:$0xff] }
 0x1eb   : > { %5797 = vmatprep.subr.bf16.mxu0 %v6119_v6  ;;  %5436 = vmatprep.mubr.msk.f32.mxu1 %vm6118_vm1, %v6117_v1  ;;  %v5843_v17 = vpack.c.bf16 %v829_v13, %v828_v12  ;;  %v861_v12 = vld [vmem:[%s7176_s8 + $0x2e8] sm:$0xff] }
 0x1ec   : > { %5802 = vmatpush3.bf16.msra.mxu1 %v5801_v20  ;;  %v830_v20 = vld [vmem:[%s7176_s8 + $0x1f0] sm:$0xff] }
 0x1ed   : > { %5803 = vmatprep.subr.bf16.mxu1 %v6119_v6  ;;  %v5846_v23 = vpack.c.bf16 %v831_v21, %v830_v20  ;;  %v5051_v21 = vld [vmem:[%s7177_s9 + $0x8] ss:$0 sm:$0xff] }
 0x1ee   : > { %5799 = vmatpush3.bf16.msra.mxu0 %v5798_v16  ;;  %v5837_v16 = vpack.c.bf16 %v825_v10, %v824_v5  ;;  %v5882_v5 = vpack.c.bf16 %v855_v0, %v854_v63  ;;  %v860_v10 = vld [vmem:[%s7176_s8 + $0x2e0] sm:$0xff] }
 0x1ef   : > { %5806 = vmatprep.subr.bf16.mxu0 %v6119_v6 }
 0x1f0   : > { %5805 = vmatpush3.bf16.msra.mxu1 %v5804_v25  ;;  %v832_v25 = vld [vmem:[%s7176_s8 + $0x200] sm:$0xff] }
 0x1f1   : > { %5426 = vmatmul.mubr.msk.f32.vlgmr.msra.gmra.mrb[10].mxu0 %vm693_vm4, %v6334_v40  ;;  %5812 = vmatprep.subr.bf16.mxu1 %v6119_v6  ;;  %v813_v40 = vld [vmem:[%s7176_s8 + $0x168] sm:$0xff] }
 0x1f2   : > { %5447 = vmatprep.mubr.msk.f32.mxu0 %vm6118_vm1, %v6117_v1  ;;  %5808 = vmatpush3.bf16.msra.mxu0 %v5807_v22  ;;  %v5819_v44 = vpack.c.bf16 %v813_v40, %v812_v11  ;;  %v5840_v22 = vpack.c.bf16 %v827_v19, %v826_v18  ;;  %v840_v11 = vld [vmem:[%s7176_s8 + $0x240] sm:$0xff]  ;;  %v841_v40 = vld [vmem:[%s7176_s8 + $0x248] sm:$0xff]  ;;  %v862_v18 = vld [vmem:[%s7176_s8 + $0x2f0] sm:$0xff] }
 0x1f3   : > { %5809 = vmatprep.subr.bf16.mxu0 %v6119_v6  ;;  %v5861_v45 = vpack.c.bf16 %v841_v40, %v840_v11  ;;  %v863_v19 = vld [vmem:[%s7176_s8 + $0x2f8] sm:$0xff]  ;;  %v5037_v11 = vld [vmem:[%s7177_s9 + $0x2] ss:$0 sm:$0xff]  ;;  %v5038_v40 = vld [vmem:[%s7177_s9 + $0x3] ss:$0 sm:$0xff] }
 0x1f4   : > { %v5894_v20 = vpack.c.bf16 %v863_v19, %v862_v18 }
 0x1f6   : > { %5811 = vmatpush3.bf16.msra.mxu0 %v5810_v28  ;;  %v836_v28 = vld [vmem:[%s7176_s8 + $0x220] sm:$0xff] }
 0x1f7   : > { %5818 = vmatprep.subr.bf16.mxu0 %v6119_v6 }
 0x2a4   : > { %v763_v31 = vpop.f32.mrb[2].mxu0  ;;  %v6484_v32 = vpop.f32.mrb[2].mxu1 }
 0x2a5   : > { %v764_v33 = vadd.f32 %v763_v31, %v692_v30  ;;  %v5339_v34 = vpop.f32.mrb[3].mxu0  ;;  %v5350_v35 = vpop.f32.mrb[3].mxu1  ;;  %v5849_v30 = vpack.c.bf16 %v833_v26, %v832_v25  ;;  %v834_v31 = vld [vmem:[%s7176_s8 + $0x210] sm:$0xff]  ;;  %v5035_v25 = vld [vmem:[%s7177_s9] ss:$0 sm:$0xff] }
 0x2a6   : > { %v5855_v34 = vpack.c.bf16 %v837_v29, %v836_v28  ;;  %v838_v35 = vld [vmem:[%s7176_s8 + $0x230] sm:$0xff]  ;;  %v5052_v29 = vld [vmem:[%s7177_s9 + $0x9] ss:$0 sm:$0xff] }
 0x2a7   : > { %5977 = vtanh.f32 %v764_v33  ;;  %v835_v33 = vld [vmem:[%s7176_s8 + $0x218] sm:$0xff] }
 0x2a8   : > { %v5852_v39 = vpack.c.bf16 %v835_v33, %v834_v31  ;;  %v5036_v31 = vld [vmem:[%s7177_s9 + $0x1] ss:$0 sm:$0xff] }
 0x2ac   : > { %v6489_v37 = vpop.f32.mrb[4].mxu0  ;;  %v6491_v38 = vpop.f32.mrb[4].mxu1 }
 0x2ad   : > { %v5361_v41 = vpop.f32.mrb[5].mxu0  ;;  %v5372_v42 = vpop.f32.mrb[5].mxu1 }
 0x2ae   : > { %v5858_v41 = vpack.c.bf16 %v839_v36, %v838_v35  ;;  %v844_v42 = vld [vmem:[%s7176_s8 + $0x260] sm:$0xff]  ;;  %v5054_v35 = vld [vmem:[%s7177_s9 + $0xb] ss:$0 sm:$0xff] }
 0x2b1   : > { %v6514_v49 = vpop.eup %5977 }
 0x2b2   : > { %5437 = vmatmul.mubr.msk.f32.vlgmr.msra.gmra.mrb[10].mxu1 %vm693_vm4, %v6514_v49  ;;  %5448 = vmatmul.mubr.msk.f32.vlgmr.msra.gmra.mrb[12].mxu0 %vm693_vm4, %v6514_v49 }
 0x2b3   : > { %5814 = vmatpush3.bf16.msra.mxu1 %v5813_v43  ;;  %5820 = vmatpush3.bf16.msra.mxu0 %v5819_v44  ;;  %v845_v43 = vld [vmem:[%s7176_s8 + $0x268] sm:$0xff]  ;;  %v6660_v44 = vld [vmem:[%s506_s16] sm:$0xff]  ;;  %s7183_s16 = sshll.u32 %s6972_s30, 3 }
 0x2b4   : > { %v6523_v53 = vpop.f32.mrb[6].mxu0  ;;  %v6525_v54 = vpop.f32.mrb[6].mxu1  ;;  %5815 = vmatprep.subr.bf16.mxu1 %v6119_v6  ;;  %5821 = vmatprep.subr.bf16.mxu0 %v6119_v6  ;;  %v5867_v48 = vpack.c.bf16 %v845_v43, %v844_v42  ;;  %s6988_s5 = scalar_lea.vmem [#allocation4], %s7183_s16 }
 0x2b5   : > { %v5383_v58 = vpop.f32.mrb[7].mxu0  ;;  %v5394_v59 = vpop.f32.mrb[7].mxu1  ;;  %5458 = vmatprep.mubr.msk.f32.mxu1 %vm6118_vm1, %v6117_v1  ;;  %5469 = vmatprep.mubr.msk.f32.mxu0 %vm6118_vm1, %v6117_v1  ;;  %s4881_s6 = sshll.u32 %s6988_s5, 4  ;;  %s4882_s6 = int_to_ptr.vmem [resolvable:$true] %s4881_s6 }
 0x2b6   : > { %v853_v58 = vld [vmem:[%s7176_s8 + $0x2a8] sm:$0xff]  ;;  %v5873_v59 = vpack.c.bf16 %v849_v55, %v848_v52  ;;  %s6021_s27 = scalar_lea.vmem %s4882_s6, 128  ;;  %p6028_p0 = scmp.lt.s32.totalorder %s4882_s6, %s6026_s24 }
 0x2b7   : > { %5817 = vmatpush3.bf16.msra.mxu1 %v5816_v50  ;;  %5823 = vmatpush3.bf16.msra.mxu0 %v5822_v51  ;;  %v847_v50 = vld [vmem:[%s7176_s8 + $0x278] sm:$0xff]  ;;  %v5864_v51 = vpack.c.bf16 %v843_v47, %v842_v46  ;;  %v5879_v62 = vpack.c.bf16 %v853_v58, %v852_v57  ;;  %v5055_v46 = vld [vmem:[%s7177_s9 + $0xc] ss:$0 sm:$0xff]  ;;  %v5057_v58 = vld [vmem:[%s7177_s9 + $0xe] ss:$0 sm:$0xff]  ;;  %p6022_p11 = scmp.ne.s32.totalorder %s4882_s6, %s6021_s27 }
 0x2b8   : > { %5824 = vmatprep.subr.bf16.mxu1 %v6119_v6  ;;  %5830 = vmatprep.subr.bf16.mxu0 %v6119_v6 }
 0x2b9   : > { %p6023_p12 = pnand %p6022_p11, %p6232_p5 }
 0x2ba   : > { %5459 = vmatmul.mubr.msk.f32.vlgmr.msra.gmra.mrb[12].mxu1 %vm693_vm4, %v6514_v49  ;;  %5470 = vmatmul.mubr.msk.f32.vlgmr.msra.gmra.mrb[14].mxu0 %vm693_vm4, %v6514_v49 }
 0x2bb   : > { %5826 = vmatpush3.bf16.msra.mxu1 %v5825_v60  ;;  %5832 = vmatpush3.bf16.msra.mxu0 %v5831_v61  ;;  %v850_v60 = vld [vmem:[%s7176_s8 + $0x290] sm:$0xff]  ;;  %v851_v61 = vld [vmem:[%s7176_s8 + $0x298] sm:$0xff]  ;;  %p6024_p13 = pneg %p6023_p12 }
 0x2bc   : > { %v6563_v7 = vpop.f32.mrb[8].mxu0  ;;  %v6565_v8 = vpop.f32.mrb[8].mxu1  ;;  %5827 = vmatprep.subr.bf16.mxu1 %v6119_v6  ;;  %5833 = vmatprep.subr.bf16.mxu0 %v6119_v6  ;;  %v5876_v2 = vpack.c.bf16 %v851_v61, %v850_v60  ;;  %v5041_v60 = vld [vmem:[%s7177_s9 + $0x6] ss:$0 sm:$0xff]  ;;  %v5042_v61 = vld [vmem:[%s7177_s9 + $0x7] ss:$0 sm:$0xff] }
 0x2bd   : > { %v5405_v14 = vpop.f32.mrb[9].mxu0  ;;  %v5416_v15 = vpop.f32.mrb[9].mxu1  ;;  %5480 = vmatprep.mubr.msk.f32.mxu1 %vm6118_vm1, %v6117_v1  ;;  %5491 = vmatprep.mubr.msk.f32.mxu0 %vm6118_vm1, %v6117_v1 }
 0x2be   : > { %v858_v14 = vld [vmem:[%s7176_s8 + $0x2d0] sm:$0xff]  ;;  %v859_v15 = vld [vmem:[%s7176_s8 + $0x2d8] sm:$0xff] }
 0x2bf   : > { %5829 = vmatpush3.bf16.msra.mxu1 %v5828_v3  ;;  %5835 = vmatpush3.bf16.msra.mxu0 %v5834_v4  ;;  %v856_v3 = vld [vmem:[%s7176_s8 + $0x2c0] sm:$0xff]  ;;  %v857_v4 = vld [vmem:[%s7176_s8 + $0x2c8] sm:$0xff] }
 0x2c0   : > { %5836 = vmatprep.subr.bf16.mxu1 %v6119_v6  ;;  %5842 = vmatprep.subr.bf16.mxu0 %v6119_v6  ;;  %v5885_v13 = vpack.c.bf16 %v857_v4, %v856_v3  ;;  %v1426_v3 = vadd.f32 %v5041_v60, %v6565_v8 }
 0x2c2   : > { %5481 = vmatmul.mubr.msk.f32.vlgmr.msra.gmra.mrb[14].mxu1 %vm693_vm4, %v6514_v49  ;;  %5492 = vmatmul.mubr.msk.f32.vlgmr.msra.gmra.mrb[16].mxu0 %vm693_vm4, %v6514_v49 }
 0x2c3   : > { %5838 = vmatpush3.bf16.msra.mxu1 %v5837_v16  ;;  %5844 = vmatpush3.bf16.msra.mxu0 %v5843_v17  ;;  %v5891_v16 = vpack.c.bf16 %v861_v12, %v860_v10  ;;  %v5888_v17 = vpack.c.bf16 %v859_v15, %v858_v14  ;;  %v5068_v10 = vld [vmem:[%s7177_s9 + $0x11] ss:$0 sm:$0xff] }
 0x2c4   : > { %v6600_v24 = vpop.f32.mrb[10].mxu0  ;;  %5839 = vmatprep.subr.bf16.mxu1 %v6119_v6  ;;  %5845 = vmatprep.subr.bf16.mxu0 %v6119_v6 }
 0x2c5   : > { %v5427_v27 = vpop.f32.mrb[11].mxu0  ;;  %5502 = vmatprep.mubr.msk.f32.mxu1 %vm6118_vm1, %v6117_v1  ;;  %5513 = vmatprep.mubr.msk.f32.mxu0 %vm6118_vm1, %v6117_v1  ;;  %v1496_v4 = vadd.f32 %v5042_v61, %v6600_v24 }
 0x2c7   : > { %5841 = vmatpush3.bf16.msra.mxu1 %v5840_v22  ;;  %5847 = vmatpush3.bf16.msra.mxu0 %v5846_v23 }
 0x2c8   : > { %5848 = vmatprep.subr.bf16.mxu1 %v6119_v6  ;;  %5854 = vmatprep.subr.bf16.mxu0 %v6119_v6 }
 0x2ca   : > { %5503 = vmatmul.mubr.msk.f32.vlgmr.msra.gmra.mrb[16].mxu1 %vm693_vm4, %v6514_v49  ;;  %5514 = vmatmul.mubr.msk.f32.vlgmr.msra.gmra.mrb[18].mxu0 %vm693_vm4, %v6514_v49  ;;  %v846_v49 = vld [vmem:[%s7176_s8 + $0x270] sm:$0xff] }
 0x2cb   : > { %5850 = vmatpush3.bf16.msra.mxu1 %v5849_v30  ;;  %5524 = vmatprep.mubr.msk.f32.mxu1 %vm6118_vm1, %v6117_v1  ;;  %v5870_v56 = vpack.c.bf16 %v847_v50, %v846_v49  ;;  %v1006_v30 = vadd.f32 %v5035_v25, %v6484_v32  ;;  %v1076_v32 = vadd.f32 %v5036_v31, %v6489_v37  ;;  %v5040_v49 = vld [vmem:[%s7177_s9 + $0x5] ss:$0 sm:$0xff] }
 0x2cc   : > { %5851 = vmatprep.subr.bf16.mxu1 %v6119_v6  ;;  %5856 = vmatpush3.bf16.msra.mxu0 %v5855_v34  ;;  %v5053_v34 = vld [vmem:[%s7177_s9 + $0xa] ss:$0 sm:$0xff]  ;;  %v1146_v37 = vadd.f32 %v5037_v11, %v6491_v38  ;;  %v5056_v38 = vld [vmem:[%s7177_s9 + $0xd] ss:$0 sm:$0xff]  ;;  %v1356_v57 = vadd.f32 %v5040_v49, %v6563_v7 }
 0x2cd   : > { %5857 = vmatprep.subr.bf16.mxu0 %v6119_v6  ;;  %5535 = vmatprep.mubr.msk.f32.mxu0 %vm6118_vm1, %v6117_v1 }
 0x2cf   : > { %5853 = vmatpush3.bf16.msra.mxu1 %v5852_v39 }
 0x2d0   : > { %5860 = vmatprep.subr.bf16.mxu1 %v6119_v6  ;;  %5859 = vmatpush3.bf16.msra.mxu0 %v5858_v41 }
 0x2d1   : > { %5866 = vmatprep.subr.bf16.mxu0 %v6119_v6 }
 0x2d2   : > { %5525 = vmatmul.mubr.msk.f32.vlgmr.msra.gmra.mrb[18].mxu1 %vm693_vm4, %v6660_v44 }
 0x2d3   : > { %5862 = vmatpush3.bf16.msra.mxu1 %v5861_v45  ;;  %5536 = vmatmul.mubr.msk.f32.vlgmr.msra.gmra.mrb[20].mxu0 %vm693_vm4, %v6660_v44  ;;  %v1216_v45 = vadd.f32 %v5038_v40, %v6523_v53 }
 0x2d4   : > { %5863 = vmatprep.subr.bf16.mxu1 %v6119_v6  ;;  %5546 = vmatprep.mubr.msk.f32.mxu1 %vm6118_vm1, %v6117_v1 }
 0x2d5   : > { %5868 = vmatpush3.bf16.msra.mxu0 %v5867_v48  ;;  %5557 = vmatprep.mubr.msk.f32.mxu0 %vm6118_vm1, %v6117_v1  ;;  %v5039_v48 = vld [vmem:[%s7177_s9 + $0x4] ss:$0 sm:$0xff] }
 0x2d6   : > { %5869 = vmatprep.subr.bf16.mxu0 %v6119_v6 }
 0x2d7   : > { %5865 = vmatpush3.bf16.msra.mxu1 %v5864_v51 }
 0x2d8   : > { %5872 = vmatprep.subr.bf16.mxu1 %v6119_v6 }
 0x2d9   : > { %5871 = vmatpush3.bf16.msra.mxu0 %v5870_v56  ;;  %v1286_v56 = vadd.f32 %v5039_v48, %v6525_v54 }
 0x2da   : > { %5547 = vmatmul.mubr.msk.f32.vlgmr.msra.gmra.mrb[20].mxu1 %vm693_vm4, %v6660_v44  ;;  %5878 = vmatprep.subr.bf16.mxu0 %v6119_v6 }
 0x2db   : > { %5874 = vmatpush3.bf16.msra.mxu1 %v5873_v59  ;;  %5568 = vmatprep.mubr.msk.f32.mxu1 %vm6118_vm1, %v6117_v1  ;;  %v5058_v59 = vld [vmem:[%s7177_s9 + $0xf] ss:$0 sm:$0xff] }
 0x2dc   : > { %5875 = vmatprep.subr.bf16.mxu1 %v6119_v6  ;;  %5558 = vmatmul.mubr.msk.f32.vlgmr.msra.gmra.mrb[22].mxu0 %vm693_vm4, %v6660_v44 }
 0x2dd   : > { %5880 = vmatpush3.bf16.msra.mxu0 %v5879_v62  ;;  %5579 = vmatprep.mubr.msk.f32.mxu0 %vm6118_vm1, %v6117_v1 }
 0x2de   : > { %5881 = vmatprep.subr.bf16.mxu0 %v6119_v6 }
 0x2df   : > { %5877 = vmatpush3.bf16.msra.mxu1 %v5876_v2 }
 0x2e0   : > { %5884 = vmatprep.subr.bf16.mxu1 %v6119_v6 }
 0x2e1   : > { %5883 = vmatpush3.bf16.msra.mxu0 %v5882_v5  ;;  %v5067_v5 = vld [vmem:[%s7177_s9 + $0x10] ss:$0 sm:$0xff] }
 0x2e2   : > { %5569 = vmatmul.mubr.msk.f32.vlgmr.msra.gmra.mrb[22].mxu1 %vm693_vm4, %v6660_v44  ;;  %5890 = vmatprep.subr.bf16.mxu0 %v6119_v6 }
 0x2e3   : > { %5886 = vmatpush3.bf16.msra.mxu1 %v5885_v13  ;;  %5590 = vmatprep.mubr.msk.f32.mxu1 %vm6118_vm1, %v6117_v1 }
 0x2e4   : > { %5887 = vmatprep.subr.bf16.mxu1 %v6119_v6  ;;  %5580 = vmatmul.mubr.msk.f32.vlgmr.msra.gmra.mrb[24].mxu0 %vm693_vm4, %v6660_v44 }
 0x2e5   : > { %5892 = vmatpush3.bf16.msra.mxu0 %v5891_v16  ;;  %5601 = vmatprep.mubr.msk.f32.mxu0 %vm6118_vm1, %v6117_v1 }
 0x2e6   : > { %5893 = vmatprep.subr.bf16.mxu0 %v6119_v6 }
 0x2e7   : > { %5889 = vmatpush3.bf16.msra.mxu1 %v5888_v17 }
 0x2e8   : > { %5604 = vmatprep.subr.mxu1 %v6117_v1 }
 0x2e9   : > { %5895 = vmatpush3.bf16.msra.mxu0 %v5894_v20 }
 0x2ea   : > { %5591 = vmatmul.mubr.msk.f32.vlgmr.msra.gmra.mrb[24].mxu1 %vm693_vm4, %v6660_v44  ;;  %5614 = vmatprep.subr.mxu0 %v6117_v1 }
 0x2eb   : > { %5606 = vmatprep.mubr.msk.f32.mxu1 %vm6118_vm1, %v6117_v1 }
 0x2ec   : > { %5602 = vmatmul.mubr.msk.f32.vlgmr.msra.gmra.mrb[26].mxu0 %vm693_vm4, %v6660_v44 }
 0x2ed   : > { %5616 = vmatprep.mubr.msk.f32.mxu0 %vm6118_vm1, %v6117_v1 }
 0x385   : > { %v1616_v22 = vpop.f32.mrb[10].mxu1  ;;  %v1686_v23 = vpop.f32.mrb[12].mxu0 }
 0x386   : > { %v1617_v26 = vadd.f32 %v5051_v21, %v1616_v22  ;;  %v5438_v27 = vpop.f32.mrb[11].mxu1  ;;  %v5449_v28 = vpop.f32.mrb[13].mxu0  ;;  %v1687_v33 = vadd.f32 %v5052_v29, %v1686_v23 }
 0x388   : > { %5605 = vmatpush3.xpose.msk.msra.mxu1 %vm2721_vm5, %v1617_v26 }
 0x389   : > { %5609 = vmatprep.subr.mxu1 %v6117_v1 }
 0x38b   : > { %5607 = vmatmul.mubr.msk.f32.vlgmr.msra.gmra.mrb[26].mxu1 %vm2721_vm5, %v1006_v30 }
 0x38c   : > { %5610 = vmatpush3.xpose.msk.msra.mxu1 %vm2721_vm5, %v1687_v33  ;;  %5611 = vmatprep.mubr.msk.f32.mxu1 %vm6118_vm1, %v6117_v1 }
 0x38d   : > { %v1756_v36 = vpop.f32.mrb[12].mxu1  ;;  %v1826_v39 = vpop.f32.mrb[14].mxu0  ;;  %5619 = vmatprep.subr.mxu1 %v6117_v1 }
 0x38e   : > { %v1757_v41 = vadd.f32 %v5053_v34, %v1756_v36  ;;  %v1827_v42 = vadd.f32 %v5054_v35, %v1826_v39  ;;  %v5460_v43 = vpop.f32.mrb[13].mxu1  ;;  %v5471_v44 = vpop.f32.mrb[15].mxu0 }
 0x38f   : > { %5612 = vmatmul.mubr.msk.f32.vlgmr.msra.gmra.mrb[28].mxu1 %vm2721_vm5, %v1076_v32 }
 0x390   : > { %5615 = vmatpush3.xpose.msk.msra.mxu0 %vm2721_vm5, %v1757_v41  ;;  %5620 = vmatpush3.xpose.msk.msra.mxu1 %vm2721_vm5, %v1827_v42 }
 0x391   : > { %5621 = vmatprep.mubr.msk.f32.mxu1 %vm6118_vm1, %v6117_v1  ;;  %5624 = vmatprep.subr.mxu0 %v6117_v1 }
 0x392   : > { %5629 = vmatprep.subr.mxu1 %v6117_v1 }
 0x393   : > { %5617 = vmatmul.mubr.msk.f32.vlgmr.msra.gmra.mrb[28].mxu0 %vm2721_vm5, %v1146_v37  ;;  %5622 = vmatmul.mubr.msk.f32.vlgmr.msra.gmra.mrb[30].mxu1 %vm2721_vm5, %v1216_v45 }
 0x394   : > { %5626 = vmatprep.mubr.msk.f32.mxu0 %vm6118_vm1, %v6117_v1  ;;  %5631 = vmatprep.mubr.msk.f32.mxu1 %vm6118_vm1, %v6117_v1 }
 0x395   : > { %v1896_v53 = vpop.f32.mrb[14].mxu1  ;;  %v1966_v47 = vpop.f32.mrb[16].mxu0 }
 0x396   : > { %v1897_v50 = vadd.f32 %v5055_v46, %v1896_v53  ;;  %v1967_v51 = vadd.f32 %v5056_v38, %v1966_v47  ;;  %v5482_v52 = vpop.f32.mrb[15].mxu1  ;;  %v5493_v55 = vpop.f32.mrb[17].mxu0 }
 0x398   : > { %5625 = vmatpush3.xpose.msk.msra.mxu0 %vm2721_vm5, %v1897_v50  ;;  %5630 = vmatpush3.xpose.msk.msra.mxu1 %vm2721_vm5, %v1967_v51 }
 0x399   : > { %5634 = vmatprep.subr.mxu0 %v6117_v1  ;;  %5639 = vmatprep.subr.mxu1 %v6117_v1 }
 0x39b   : > { %5627 = vmatmul.mubr.msk.f32.vlgmr.msra.gmra.mrb[30].mxu0 %vm2721_vm5, %v1286_v56  ;;  %5632 = vmatmul.mubr.msk.f32.vlgmr.msra.gmra.mrb[32].mxu1 %vm2721_vm5, %v1356_v57 }
 0x39c   : > { %5636 = vmatprep.mubr.msk.f32.mxu0 %vm6118_vm1, %v6117_v1  ;;  %5641 = vmatprep.mubr.msk.f32.mxu1 %vm6118_vm1, %v6117_v1 }
 0x39d   : > { %v2036_v54 = vpop.f32.mrb[16].mxu1  ;;  %v2106_v7 = vpop.f32.mrb[18].mxu0 }
 0x39e   : > { %v2037_v62 = vadd.f32 %v5057_v58, %v2036_v54  ;;  %v2107_v63 = vadd.f32 %v5058_v59, %v2106_v7  ;;  %v5504_v0 = vpop.f32.mrb[17].mxu1  ;;  %v5515_v2 = vpop.f32.mrb[19].mxu0 }
 0x3a0   : > { %5635 = vmatpush3.xpose.msk.msra.mxu0 %vm2721_vm5, %v2037_v62  ;;  %5640 = vmatpush3.xpose.msk.msra.mxu1 %vm2721_vm5, %v2107_v63 }
 0x3a1   : > { %5644 = vmatprep.subr.mxu0 %v6117_v1  ;;  %5649 = vmatprep.subr.mxu1 %v6117_v1 }
 0x3a3   : > { %5637 = vmatmul.mubr.msk.f32.vlgmr.msra.gmra.mrb[32].mxu0 %vm2721_vm5, %v1426_v3  ;;  %5642 = vmatmul.mubr.msk.f32.vlgmr.msra.gmra.mrb[34].mxu1 %vm2721_vm5, %v1496_v4 }
 0x3a4   : > { %5646 = vmatprep.mubr.msk.f32.mxu0 %vm6118_vm1, %v6117_v1  ;;  %5651 = vmatprep.mubr.msk.f32.mxu1 %vm6118_vm1, %v6117_v1 }
 0x3a5   : > { %v2227_v8 = vpop.f32.mrb[18].mxu1 }
 0x3a6   : > { %v2228_v24 = vadd.f32 %v5067_v5, %v2227_v8  ;;  %v5526_v12 = vpop.f32.mrb[19].mxu1  ;;  %v2297_v13 = vpop.f32.mrb[20].mxu0 }
 0x3a7   : > { %v2298_v14 = vadd.f32 %v5068_v10, %v2297_v13  ;;  %v5537_v15 = vpop.f32.mrb[21].mxu0 }
 0x3a8   : > { %5645 = vmatpush3.msra.mxu0 %v2228_v24 }
 0x3a9   : > { %5650 = vmatpush3.msra.mxu1 %v2298_v14  ;;  %5654 = vmatprep.subr.mxu0 %v6117_v1 }
 0x3aa   : > { %5659 = vmatprep.subr.mxu1 %v6117_v1 }
 0x3ad   : > { %v6872_v16 = vpop.f32.mrb[20].mxu1 }
 0x3ae   : > { %v5548_v17 = vpop.f32.mrb[21].mxu1 }
 0x3af   : > { %v6874_v18 = vpop.f32.mrb[22].mxu0 }
 0x3b0   : > { %v5559_v19 = vpop.f32.mrb[23].mxu0 }
 0x3b5   : > { %v6876_v20 = vpop.f32.mrb[22].mxu1 }
 0x3b6   : > { %v5570_v21 = vpop.f32.mrb[23].mxu1 }
 0x3b7   : > { %v6878_v22 = vpop.f32.mrb[24].mxu0 }
 0x3b8   : > { %v5581_v23 = vpop.f32.mrb[25].mxu0 }
 0x3bd   : > { %v6880_v25 = vpop.f32.mrb[24].mxu1 }
 0x3be   : > { %v5592_v26 = vpop.f32.mrb[25].mxu1 }
 0x3bf   : > { %v6882_v27 = vpop.f32.mrb[26].mxu0 }
 0x3c0   : > { %v5603_v28 = vpop.f32.mrb[27].mxu0 }
 0x45e   : > { %v2794_v29 = vpop.f32.mrb[26].mxu1 }
 0x45f   : > { %v5608_v30 = vpop.f32.mrb[27].mxu1  ;;  %v3330_v31 = vsel %vm609_vm3, %v2794_v29, -inf }
 0x460   : > { %3331 = vmax.xlane.f32.xlu0 %v3330_v31 }
 0x462   : > { %v2870_v33 = vpop.f32.mrb[28].mxu1 }
 0x463   : > { %v5613_v34 = vpop.f32.mrb[29].mxu1  ;;  %v3333_v35 = vsel %vm609_vm3, %v2870_v33, -inf }
 0x464   : > { %3334 = vmax.xlane.f32.xlu0 %v3333_v35 }
 0x466   : > { %v2946_v32 = vpop.f32.mrb[28].mxu0  ;;  %v3022_v36 = vpop.f32.mrb[30].mxu1 }
 0x467   : > { %v5618_v39 = vpop.f32.mrb[29].mxu0  ;;  %v3336_v11 = vsel %vm609_vm3, %v2946_v32, -inf  ;;  %v5623_v40 = vpop.f32.mrb[31].mxu1  ;;  %v3339_v41 = vsel %vm609_vm3, %v3022_v36, -inf }
 0x468   : > { %3337 = vmax.xlane.f32.xlu1 %v3336_v11 }
 0x46c   : > { %3340 = vmax.xlane.f32.xlu1 %v3339_v41 }
 0x46e   : > { %v3098_v42 = vpop.f32.mrb[30].mxu0  ;;  %v3174_v43 = vpop.f32.mrb[32].mxu1 }
 0x46f   : > { %v5628_v44 = vpop.f32.mrb[31].mxu0  ;;  %v5633_v37 = vpop.f32.mrb[33].mxu1  ;;  %v3342_v45 = vsel %vm609_vm3, %v3098_v42, -inf  ;;  %v3345_v46 = vsel %vm609_vm3, %v3174_v43, -inf }
 0x470   : > { %3343 = vmax.xlane.f32.xlu0 %v3342_v45  ;;  %3346 = vmax.xlane.f32.xlu1 %v3345_v46  ;;  %v5070_v46 = vld [vmem:[%s7177_s9 + $0x13] ss:$0 sm:$0xff] }
 0x476   : > { %v3250_v38 = vpop.f32.mrb[32].mxu0  ;;  %v3326_v53 = vpop.f32.mrb[34].mxu1 }
 0x477   : > { %v5638_v47 = vpop.f32.mrb[33].mxu0  ;;  %v5643_v48 = vpop.f32.mrb[35].mxu1  ;;  %v3348_v49 = vsel %vm609_vm3, %v3250_v38, -inf  ;;  %v3351_v50 = vsel %vm609_vm3, %v3326_v53, -inf }
 0x478   : > { %3349 = vmax.xlane.f32.xlu0 %v3348_v49  ;;  %3352 = vmax.xlane.f32.xlu1 %v3351_v50  ;;  %v2438_v48 = vadd.f32 %v5070_v46, %v6874_v18  ;;  %v5071_v49 = vld [vmem:[%s7177_s9 + $0x14] ss:$0 sm:$0xff]  ;;  %v5072_v18 = vld [vmem:[%s7177_s9 + $0x15] ss:$0 sm:$0xff] }
 0x4ed   : > { %v3332_v51 = vpop.xlane.xlu0 %3331 }
 0x4ee   : > { %v3354_v52 = vsub.f32 %v2794_v29, %v3332_v51 }
 0x4f0   : > { %v3362_v55 = vmul.f32 1.442695, %v3354_v52  ;;  %v2508_v52 = vadd.f32 %v5071_v49, %v6876_v20  ;;  %v2578_v20 = vadd.f32 %v5072_v18, %v6878_v22 }
 0x4f1   : > { %v3335_v56 = vpop.xlane.xlu0 %3334 }
 0x4f2   : > { %5979 = vpow2.f32 %v3362_v55  ;;  %v3355_v57 = vsub.f32 %v2870_v33, %v3335_v56 }
 0x4f4   : > { %v3364_v58 = vmul.f32 1.442695, %v3355_v57 }
 0x4f5   : > { %v3338_v59 = vpop.xlane.xlu1 %3337 }
 0x4f6   : > { %5981 = vpow2.f32 %v3364_v58  ;;  %v3356_v54 = vsub.f32 %v2946_v32, %v3338_v59 }
 0x4f8   : > { %v3366_v7 = vmul.f32 1.442695, %v3356_v54 }
 0x4f9   : > { %v3341_v60 = vpop.xlane.xlu1 %3340 }
 0x4fa   : > { %5983 = vpow2.f32 %v3366_v7  ;;  %v3357_v61 = vsub.f32 %v3022_v36, %v3341_v60  ;;  %v5073_v60 = vld [vmem:[%s7177_s9 + $0x16] ss:$0 sm:$0xff] }
 0x4fc   : > { %v5980_v62 = vpop.eup %5979  ;;  %v3368_v63 = vmul.f32 1.442695, %v3357_v61 }
 0x4fd   : > { %v3344_v0 = vpop.xlane.xlu0 %3343  ;;  %v3347_v2 = vpop.xlane.xlu1 %3346  ;;  %v3378_v3 = vsel %vm609_vm3, %v5980_v62, 0.0 }
 0x4fe   : > { %5985 = vpow2.f32 %v3368_v63  ;;  %v3358_v4 = vsub.f32 %v3098_v42, %v3344_v0  ;;  %v3359_v5 = vsub.f32 %v3174_v43, %v3347_v2  ;;  %3379 = vadd.xlane.f32.xlu0 %v3378_v3  ;;  %v5069_v42 = vld [vmem:[%s7177_s9 + $0x12] ss:$0 sm:$0xff]  ;;  %v5074_v63 = vld [vmem:[%s7177_s9 + $0x17] ss:$0 sm:$0xff]  ;;  %v2648_v3 = vadd.f32 %v5073_v60, %v6880_v25 }
 0x4ff   : > { %v2368_v45 = vadd.f32 %v5069_v42, %v6872_v16 }
 0x500   : > { %v5982_v10 = vpop.eup %5981  ;;  %v3370_v8 = vmul.f32 1.442695, %v3358_v4  ;;  %v3372_v24 = vmul.f32 1.442695, %v3359_v5 }
 0x501   : > { %v3381_v12 = vsel %vm609_vm3, %v5982_v10, 0.0 }
 0x502   : > { %5987 = vpow2.f32 %v3370_v8  ;;  %3382 = vadd.xlane.f32.xlu1 %v3381_v12 }
 0x503   : > { %5989 = vpow2.f32 %v3372_v24 }
 0x504   : > { %v5984_v13 = vpop.eup %5983 }
 0x505   : > { %v3350_v14 = vpop.xlane.xlu0 %3349  ;;  %v3353_v15 = vpop.xlane.xlu1 %3352  ;;  %v3384_v17 = vsel %vm609_vm3, %v5984_v13, 0.0 }
 0x506   : > { %v3360_v19 = vsub.f32 %v3250_v38, %v3350_v14  ;;  %v3361_v21 = vsub.f32 %v3326_v53, %v3353_v15  ;;  %3385 = vadd.xlane.f32.xlu0 %v3384_v17 }
 0x508   : > { %v5986_v23 = vpop.eup %5985  ;;  %v3374_v26 = vmul.f32 1.442695, %v3360_v19  ;;  %v3376_v28 = vmul.f32 1.442695, %v3361_v21 }
 0x509   : > { %v3387_v29 = vsel %vm609_vm3, %v5986_v23, 0.0 }
 0x50a   : > { %5991 = vpow2.f32 %v3374_v26  ;;  %3388 = vadd.xlane.f32.xlu1 %v3387_v29 }
 0x50b   : > { %5993 = vpow2.f32 %v3376_v28  ;;  %v4845_v28 = vld [vmem:[%s514_s22] sm:$0xff]  ;;  %s6120_s22 = smov 96  }
 0x50c   : > { %v6896_v30 = vpop.eup %5987 }
 0x50d   : > { %v6898_v31 = vpop.eup %5989  ;;  %v3390_v33 = vsel %vm609_vm3, %v6896_v30, 0.0 }
 0x50e   : > { %3391 = vadd.xlane.f32.xlu0 %v3390_v33  ;;  %v3393_v34 = vsel %vm609_vm3, %v6898_v31, 0.0  ;;  %v4003_v33 = vld [vmem:[%s7178_s10 + $0x4] sm:$0xf] }
 0x50f   : > { %3394 = vadd.xlane.f32.xlu1 %v3393_v34  ;;  %v6015_v34 = vld [vmem:[%s7175_s7] sm:$0xff] }
 0x514   : > { %v6904_v35 = vpop.eup %5991 }
 0x515   : > { %v6906_v32 = vpop.eup %5993  ;;  %v3396_v36 = vsel %vm609_vm3, %v6904_v35, 0.0 }
 0x516   : > { %3397 = vadd.xlane.f32.xlu0 %v3396_v36  ;;  %v3399_v39 = vsel %vm609_vm3, %v6906_v32, 0.0  ;;  %v6017_v36 = vld [vmem:[%s7175_s7 + $0x10] sm:$0xff] }
 0x517   : > { %3400 = vadd.xlane.f32.xlu1 %v3399_v39  ;;  %v6018_v39 = vld [vmem:[%s7175_s7 + $0x18] sm:$0xff] }
 0x58b   : > { %v3380_v11 = vpop.xlane.xlu0 %3379 }
 0x58c   : > { %5995 = vrcp.f32 %v3380_v11  ;;  %v5967_v11 = vpack.i.bf16 %v6018_v39, %v6017_v36 }
 0x58f   : > { %v3383_v40 = vpop.xlane.xlu1 %3382 }
 0x590   : > { %5997 = vrcp.f32 %v3383_v40  ;;  %v4004_v40 = vld [vmem:[%s7178_s10 + $0x8] sm:$0xf] }
 0x593   : > { %v3386_v41 = vpop.xlane.xlu0 %3385 }
 0x594   : > { %5999 = vrcp.f32 %v3386_v41 }
 0x596   : > { %v5996_v43 = vpop.eup %5995 }
 0x597   : > { %v3410_v44 = vmul.f32 %v5996_v43, %v5980_v62  ;;  %v3389_v37 = vpop.xlane.xlu1 %3388  ;;  %v4005_v43 = vld [vmem:[%s7178_s10 + $0xc] sm:$0xf] }
 0x598   : > { %6001 = vrcp.f32 %v3389_v37 }
 0x599   : > { %5647 = vmatmul.mubr.msk.f32.vlgmr.msra.gmra.mrb[34].mxu0 %vm609_vm3, %v3410_v44  ;;  %v4828_v57 = vsel %vm609_vm3, %v3410_v44, 0.0 }
 0x59a   : > { %v5998_v38 = vpop.eup %5997  ;;  %5655 = vmatpush3.msra.mxu0 %v2368_v45  ;;  %5656 = vmatprep.mubr.msk.f32.mxu0 %vm6118_vm1, %v6117_v1  ;;  %v4006_v45 = vld [vmem:[%s7178_s10 + $0x10] sm:$0xf] }
 0x59b   : > { %v3411_v53 = vmul.f32 %v5998_v38, %v5982_v10  ;;  %v3392_v47 = vpop.xlane.xlu0 %3391  ;;  %5664 = vmatprep.subr.mxu0 %v6117_v1  ;;  %v2718_v10 = vadd.f32 %v5074_v63, %v6882_v27 }
 0x59c   : > { %6003 = vrcp.f32 %v3392_v47  ;;  %v3395_v16 = vpop.xlane.xlu1 %3394 }
 0x59d   : > { %6005 = vrcp.f32 %v3395_v16  ;;  %5652 = vmatmul.mubr.msk.f32.vlgmr.msra.gmra.mrb[36].mxu1 %vm609_vm3, %v3411_v53  ;;  %v4829_v55 = vsel %vm609_vm3, %v3411_v53, 0.0  ;;  %v4007_v53 = vld [vmem:[%s7178_s10 + $0x14] sm:$0xf]  ;;  %v4008_v16 = vld [vmem:[%s7178_s10 + $0x18] sm:$0xf] }
 0x59e   : > { %v6000_v50 = vpop.eup %5999  ;;  %5660 = vmatpush3.msra.mxu1 %v2438_v48  ;;  %5661 = vmatprep.mubr.msk.f32.mxu1 %vm6118_vm1, %v6117_v1  ;;  %v4830_v54 = vadd.f32 %v4829_v55, %v4828_v57 }
 0x59f   : > { %v3412_v51 = vmul.f32 %v6000_v50, %v5984_v13  ;;  %5669 = vmatprep.subr.mxu1 %v6117_v1  ;;  %v4009_v50 = vld [vmem:[%s7178_s10 + $0x1c] sm:$0xf] }
 0x5a1   : > { %5657 = vmatmul.mubr.msk.f32.vlgmr.msra.gmra.mrb[36].mxu0 %vm609_vm3, %v3412_v51  ;;  %v4831_v61 = vsel %vm609_vm3, %v3412_v51, 0.0 }
 0x5a2   : > { %v6002_v56 = vpop.eup %6001  ;;  %5665 = vmatpush3.msra.mxu0 %v2508_v52  ;;  %5666 = vmatprep.mubr.msk.f32.mxu0 %vm6118_vm1, %v6117_v1  ;;  %v4832_v4 = vadd.f32 %v4831_v61, %v4830_v54 }
 0x5a3   : > { %v3413_v58 = vmul.f32 %v6002_v56, %v5986_v23  ;;  %v3398_v59 = vpop.xlane.xlu0 %3397  ;;  %5674 = vmatprep.subr.mxu0 %v6117_v1 }
 0x5a4   : > { %6007 = vrcp.f32 %v3398_v59  ;;  %v3401_v7 = vpop.xlane.xlu1 %3400 }
 0x5a5   : > { %6009 = vrcp.f32 %v3401_v7  ;;  %5662 = vmatmul.mubr.msk.f32.vlgmr.msra.gmra.mrb[38].mxu1 %vm609_vm3, %v3413_v58  ;;  %v4833_v0 = vsel %vm609_vm3, %v3413_v58, 0.0 }
 0x5a6   : > { %v6004_v62 = vpop.eup %6003  ;;  %5670 = vmatpush3.msra.mxu1 %v2578_v20  ;;  %5671 = vmatprep.mubr.msk.f32.mxu1 %vm6118_vm1, %v6117_v1  ;;  %v4834_v24 = vadd.f32 %v4833_v0, %v4832_v4 }
 0x5a7   : > { %v6006_v22 = vpop.eup %6005  ;;  %v3414_v2 = vmul.f32 %v6004_v62, %v6896_v30  ;;  %5679 = vmatprep.subr.mxu1 %v6117_v1 }
 0x5a8   : > { %v3415_v5 = vmul.f32 %v6006_v22, %v6898_v31  ;;  %v4002_v31 = vld [vmem:[%s7178_s10] sm:$0xf] }
 0x5a9   : > { %v4835_v8 = vsel %vm609_vm3, %v3414_v2, 0.0  ;;  %5667 = vmatmul.mubr.msk.f32.vlgmr.msra.gmra.mrb[38].mxu0 %vm609_vm3, %v3414_v2 }
 0x5aa   : > { %5672 = vmatmul.mubr.msk.f32.vlgmr.msra.gmra.mrb[40].mxu1 %vm609_vm3, %v3415_v5  ;;  %5675 = vmatpush3.msra.mxu0 %v2648_v3  ;;  %v4836_v25 = vadd.f32 %v4835_v8, %v4834_v24  ;;  %v4837_v13 = vsel %vm609_vm3, %v3415_v5, 0.0  ;;  %v7071_v8 = vld [vmem:[%s6311_s21] sm:$0xff]  ;;  %s6027_s21 = scalar_lea.vmem %s6026_s24, 256 }
 0x5ab   : > { %5680 = vmatpush3.msra.mxu1 %v2718_v10  ;;  %5676 = vmatprep.mubr.msk.f32.mxu0 %vm6118_vm1, %v6117_v1  ;;  %p6029_p1 = scmp.lt.s32.totalorder %s6027_s21, %s6021_s27 }
 0x5ac   : > { %5681 = vmatprep.mubr.msk.f32.mxu1 %vm6118_vm1, %v6117_v1  ;;  %5684 = vmatprep.subr.mxu0 %v6117_v1  ;;  %v4838_v17 = vadd.f32 %v4837_v13, %v4836_v25 }
 0x5ad   : > { %5689 = vmatprep.subr.mxu1 %v6117_v1  ;;  %p6030_p2 = por %p6029_p1, %p6028_p0 }
 0x5ae   : > { %v6008_v27 = vpop.eup %6007 }
 0x5af   : > { %v6010_v12 = vpop.eup %6009  ;;  %v3416_v14 = vmul.f32 %v6008_v27, %v6904_v35  ;;  %v6016_v35 = vld [vmem:[%s7175_s7 + $0x8] sm:$0xff]  ;;  %p6031_p3 = pnand %p6030_p2, %p6024_p13 }
 0x5b0   : > { %v3417_v15 = vmul.f32 %v6010_v12, %v6906_v32  ;;  %v5962_v32 = vpack.i.bf16 %v6016_v35, %v6015_v34 }
 0x5b1   : > { %5677 = vmatmul.mubr.msk.f32.vlgmr.msra.gmra.mrb[40].mxu0 %vm609_vm3, %v3416_v14  ;;  %v4839_v19 = vsel %vm609_vm3, %v3416_v14, 0.0 }
 0x5b2   : > { %5682 = vmatmul.mubr.msk.f32.vlgmr.msra.gmra.mrb[42].mxu1 %vm609_vm3, %v3417_v15  ;;  %5686 = vmatprep.mubr.msk.f32.mxu0 %vm6118_vm1, %v6117_v1  ;;  %v4840_v21 = vadd.f32 %v4839_v19, %v4838_v17  ;;  %v4841_v23 = vsel %vm609_vm3, %v3417_v15, 0.0 }
 0x5b3   : > { %5691 = vmatprep.mubr.msk.f32.mxu1 %vm6118_vm1, %v6117_v1  ;;  %5685 = vmatpush3.msk.msra.mxu0 %vm4013_vm6, %v4002_v31 }
 0x5b4   : > { %v4842_v26 = vadd.f32 %v4841_v23, %v4840_v21  ;;  %5694 = vmatprep.subr.mxu0 %v6117_v1  ;;  %5690 = vmatpush3.msk.msra.mxu1 %vm4013_vm6, %v4003_v33 }
 0x5b5   : > { %5699 = vmatprep.subr.mxu1 %v6117_v1  ;;  %5963 = vrot.lane.b32.xlu1 %v5962_v32, %s6120_s22 }
 0x5b6   : > { %v4844_v29 = vmul.f32 0.125, %v4842_v26  ;;  %5958 = vrot.lane.b32.xlu0 %v5962_v32, %s6121_s3 }
 0x5b8   : > { %v4846_v30 = vmul.f32 %v4845_v28, %v4844_v29 }
 0x5b9   : > { %5968 = vrot.lane.b32.xlu1 %v5967_v11, %s6121_s3  ;;  %s7094_s3 = scalar_lea.hbm %s7181_s13, %s5128_s20 }
 0x5ba   : > { %4848 = vst.msk [vmem:[%s6988_s5] sm:$0xff] %vm609_vm3, %v4846_v30 }
 0x5bd   : > { %5973 = vrot.lane.b32.xlu1 %v5967_v11, %s6120_s22  ;;  %v4636_v11 = vsub.s32 3, %v6273_v9 }
 0x627   : > { %v5964_v59 = vpop.permute.xlu1 %5963 }
 0x628   : > { %v5959_v20 = vpop.permute.xlu0 %5958  ;;  %v5966_v54 = vunpack.i.h.bf16 %v5964_v59  ;;  %v5965_v7 = vunpack.i.l.bf16 %v5964_v59 }
 0x629   : > { %v5961_v60 = vunpack.i.h.bf16 %v5959_v20  ;;  %v5960_v61 = vunpack.i.l.bf16 %v5959_v20 }
 0x62a   : > { %v5903_v62 = vpack.c.bf16 %v5966_v54, %v5965_v7 }
 0x62b   : > { %v5897_v63 = vpack.c.bf16 %v5961_v60, %v5960_v61  ;;  %v5969_v22 = vpop.permute.xlu1 %5968 }
 0x62c   : > { %v5971_v0 = vunpack.i.h.bf16 %v5969_v22  ;;  %v5970_v2 = vunpack.i.l.bf16 %v5969_v22 }
 0x62e   : > { %v5900_v3 = vpack.c.bf16 %v5971_v0, %v5970_v2 }
 0x66c   : > { %v3487_v41 = vpop.f32.mrb[34].mxu0 }
 0x66d   : > { %v5648_v42 = vpop.f32.mrb[35].mxu0  ;;  %5687 = vmatmul.mubr.msk.f32.vlgmr.msra.gmra.mrb[42].mxu0 %vm2721_vm5, %v3487_v41 }
 0x66e   : > { %5695 = vmatpush3.msk.msra.mxu0 %vm4013_vm6, %v4004_v40  ;;  %5696 = vmatprep.mubr.msk.f32.mxu0 %vm6118_vm1, %v6117_v1 }
 0x66f   : > { %5704 = vmatprep.subr.mxu0 %v6117_v1 }
 0x670   : > { %v3560_v44 = vpop.f32.mrb[36].mxu1 }
 0x671   : > { %v5653_v37 = vpop.f32.mrb[37].mxu1  ;;  %5692 = vmatmul.mubr.msk.f32.vlgmr.msra.gmra.mrb[44].mxu1 %vm2721_vm5, %v3560_v44 }
 0x672   : > { %5700 = vmatpush3.msk.msra.mxu1 %vm4013_vm6, %v4005_v43  ;;  %5701 = vmatprep.mubr.msk.f32.mxu1 %vm6118_vm1, %v6117_v1  ;;  %v6020_v37 = vld [vmem:[%s7179_s11] sm:$0x1f] }
 0x673   : > { %5709 = vmatprep.subr.mxu1 %v6117_v1 }
 0x674   : > { %v3633_v46 = vpop.f32.mrb[36].mxu0 }
 0x675   : > { %v5658_v38 = vpop.f32.mrb[37].mxu0  ;;  %5697 = vmatmul.mubr.msk.f32.vlgmr.msra.gmra.mrb[44].mxu0 %vm2721_vm5, %v3633_v46 }
 0x676   : > { %5705 = vmatpush3.msk.msra.mxu0 %vm4013_vm6, %v4006_v45  ;;  %5706 = vmatprep.mubr.msk.f32.mxu0 %vm6118_vm1, %v6117_v1  ;;  %v4637_v45 = vrot.slane %v6020_v37, %v4636_v11 }
 0x677   : > { %5714 = vmatprep.subr.mxu0 %v6117_v1 }
 0x678   : > { %v3706_v47 = vpop.f32.mrb[38].mxu1 }
 0x679   : > { %v5663_v48 = vpop.f32.mrb[39].mxu1  ;;  %5702 = vmatmul.mubr.msk.f32.vlgmr.msra.gmra.mrb[46].mxu1 %vm2721_vm5, %v3706_v47 }
 0x67a   : > { %5710 = vmatpush3.msk.msra.mxu1 %vm4013_vm6, %v4007_v53  ;;  %5711 = vmatprep.mubr.msk.f32.mxu1 %vm6118_vm1, %v6117_v1 }
 0x67b   : > { %5719 = vmatprep.subr.mxu1 %v6117_v1 }
 0x67c   : > { %v3779_v49 = vpop.f32.mrb[38].mxu0 }
 0x67d   : > { %v3852_v51 = vpop.f32.mrb[40].mxu1  ;;  %v5668_v52 = vpop.f32.mrb[39].mxu0  ;;  %5707 = vmatmul.mubr.msk.f32.vlgmr.msra.gmra.mrb[46].mxu0 %vm2721_vm5, %v3779_v49 }
 0x67e   : > { %v5673_v18 = vpop.f32.mrb[41].mxu1  ;;  %5712 = vmatmul.mubr.msk.f32.vlgmr.msra.gmra.mrb[48].mxu1 %vm2721_vm5, %v3852_v51  ;;  %5715 = vmatpush3.msk.msra.mxu0 %vm4013_vm6, %v4008_v16 }
 0x67f   : > { %5716 = vmatprep.mubr.msk.f32.mxu0 %vm6118_vm1, %v6117_v1  ;;  %5720 = vmatpush3.msk.msra.mxu1 %vm4013_vm6, %v4009_v50 }
 0x680   : > { %5721 = vmatprep.mubr.msk.f32.mxu1 %vm6118_vm1, %v6117_v1  ;;  %5896 = vmatprep.subr.bf16.mxu0 %v6119_v6 }
 0x681   : > { %5902 = vmatprep.subr.bf16.mxu1 %v6119_v6 }
 0x684   : > { %v3925_v55 = vpop.f32.mrb[40].mxu0 }
 0x685   : > { %v3998_v56 = vpop.f32.mrb[42].mxu1  ;;  %v5678_v57 = vpop.f32.mrb[41].mxu0  ;;  %5717 = vmatmul.mubr.msk.f32.vlgmr.msra.gmra.mrb[48].mxu0 %vm2721_vm5, %v3925_v55 }
 0x686   : > { %v5683_v58 = vpop.f32.mrb[43].mxu1  ;;  %5722 = vmatmul.mubr.msk.f32.vlgmr.msra.gmra.mrb[50].mxu1 %vm2721_vm5, %v3998_v56  ;;  %5732 = vmatprep.mubr.msk.f32.mxu0 %vm6118_vm1, %v6117_v1 }
 0x687   : > { %5743 = vmatprep.mubr.msk.f32.mxu1 %vm6118_vm1, %v6117_v1  ;;  %5898 = vmatpush3.bf16.msra.mxu0 %v5897_v63  ;;  %v5974_v1 = vpop.permute.xlu1 %5973 }
 0x688   : > { %5904 = vmatpush3.bf16.msra.mxu1 %v5903_v62  ;;  %5899 = vmatprep.subr.bf16.mxu0 %v6119_v6  ;;  %v5976_v4 = vunpack.i.h.bf16 %v5974_v1  ;;  %v5975_v5 = vunpack.i.l.bf16 %v5974_v1 }
 0x689   : > { %5905 = vmatprep.subr.bf16.mxu1 %v6119_v6 }
 0x68a   : > { %v5906_v10 = vpack.c.bf16 %v5976_v4, %v5975_v5 }
 0x68b   : > { %5901 = vmatpush3.bf16.msra.mxu0 %v5900_v3 }
 0x68c   : > { %5907 = vmatpush3.bf16.msra.mxu1 %v5906_v10 }
 0x68e   : > { %5733 = vmatmul.mubr.msk.f32.vlgmr.msra.gmra.mrb[50].mxu0 %vm693_vm4, %v7071_v8 }
 0x740   : > { %v4083_v24 = vpop.f32.mrb[42].mxu0 }
 0x741   : > { %v5688_v25 = vpop.f32.mrb[43].mxu0  ;;  %v4619_v12 = vsel %vm693_vm4, %v4083_v24, 0.0 }
 0x744   : > { %v4159_v27 = vpop.f32.mrb[44].mxu1 }
 0x745   : > { %v4620_v13 = vsel %vm693_vm4, %v4159_v27, 0.0  ;;  %v5693_v6 = vpop.f32.mrb[45].mxu1 }
 0x746   : > { %v4621_v14 = vadd.f32 %v4620_v13, %v4619_v12 }
 0x748   : > { %v4235_v15 = vpop.f32.mrb[44].mxu0 }
 0x749   : > { %v4622_v17 = vsel %vm693_vm4, %v4235_v15, 0.0  ;;  %v5698_v19 = vpop.f32.mrb[45].mxu0 }
 0x74a   : > { %v4623_v21 = vadd.f32 %v4622_v17, %v4621_v14 }
 0x74c   : > { %v4311_v23 = vpop.f32.mrb[46].mxu1 }
 0x74d   : > { %v4624_v26 = vsel %vm693_vm4, %v4311_v23, 0.0  ;;  %v5703_v28 = vpop.f32.mrb[47].mxu1 }
 0x74e   : > { %v4625_v29 = vadd.f32 %v4624_v26, %v4623_v21 }
 0x750   : > { %v4387_v30 = vpop.f32.mrb[46].mxu0 }
 0x751   : > { %v4626_v31 = vsel %vm693_vm4, %v4387_v30, 0.0  ;;  %v4463_v33 = vpop.f32.mrb[48].mxu1  ;;  %v5708_v34 = vpop.f32.mrb[47].mxu0 }
 0x752   : > { %v4627_v35 = vadd.f32 %v4626_v31, %v4625_v29  ;;  %v5713_v32 = vpop.f32.mrb[49].mxu1  ;;  %v4628_v36 = vsel %vm693_vm4, %v4463_v33, 0.0 }
 0x754   : > { %v4629_v39 = vadd.f32 %v4628_v36, %v4627_v35 }
 0x758   : > { %v4539_v40 = vpop.f32.mrb[48].mxu0 }
 0x759   : > { %v4630_v41 = vsel %vm693_vm4, %v4539_v40, 0.0  ;;  %v4615_v42 = vpop.f32.mrb[50].mxu1  ;;  %v5718_v43 = vpop.f32.mrb[49].mxu0 }
 0x75a   : > { %v4631_v44 = vadd.f32 %v4630_v41, %v4629_v39  ;;  %v5723_v46 = vpop.f32.mrb[51].mxu1  ;;  %v4632_v38 = vsel %vm693_vm4, %v4615_v42, 0.0 }
 0x75c   : > { %v4633_v53 = vadd.f32 %v4632_v38, %v4631_v44 }
 0x75e   : > { %v4638_v47 = vadd.f32 %v4637_v45, %v4633_v53 }
 0x760   : > { %5744 = vmatmul.mubr.msk.f32.vlgmr.msra.gmra.mrb[52].mxu1 %vm693_vm4, %v4638_v47 }
 0x761   : > { %v4724_v48 = vpop.f32.mrb[50].mxu0 }
 0x762   : > { %v5734_v16 = vpop.f32.mrb[51].mxu0 }
 0x763   : > { %6034 = shalt.err (!%p6031_p3)
}
 0x764   : > { %s6035_s5 = scalar_lea.hbm %s7094_s3, 128  ;;  %s6039_s22 = scalar_lea.hbm %s7181_s13, 256 }
 0x765   : > { %p6036_p4 = scmp.ne.s32.totalorder %s7094_s3, %s6035_s5  ;;  %p6040_p9 = scmp.lt.u32.totalorder %s7094_s3, %s7181_s13 }
 0x766   : > { %p6041_p10 = scmp.lt.u32.totalorder %s6039_s22, %s6035_s5  ;;  %p6043_p12 = scmp.lt.u32.totalorder %s6035_s5, %s7094_s3 }
 0x767   : > { %p6037_p7 = pnand %p6036_p4, %p6232_p5 }
 0x768   : > { %p6042_p11 = por %p6041_p10, %p6040_p9 }
 0x769   : > { %p6038_p8 = pneg %p6037_p7 }
 0x76a   : > { %p6044_p13 = por %p6043_p12, %p6042_p11 }
 0x76c   : > { %p6045_p0 = pnand %p6044_p13, %p6038_p8 }
 0x76e   : > { %6048 = shalt.err (!%p6045_p0)
}
 0x76f   : > { %5909 = dma.vmem_to_hbm [thread:$0]  (%p6232_p5), %s4882_s6, 128, %s7094_s3, %s4855_s23   ;;  %v4815_v49 = vsub.s32 4, %v6273_v9 }
 0x770   : > { %s7194_s27 = sshll.u32 %s6972_s30, 3  ;;  %s7124_s5 = scalar_lea.hbm %s7180_s12, %s5128_s20 }
 0x771   : > { %v4816_v50 = vrot.slane %v6020_v37, %v4815_v49  ;;  %s487_s21 = scalar_lea.vmem [#allocation2], %s7194_s27  ;;  %s4850_s15 = scalar_lea.sflag [#allocation3], %s6972_s30 }
 0x772   : > { %s4868_s3 = sshll.u32 %s487_s21, 4  ;;  %s6123_s22 = smov [#allocation2]   ;;  %s7126_s3 = int_to_ptr.vmem [resolvable:$true] %s4868_s3 }
 0x773   : > { %s6049_s16 = scalar_lea.vmem %s7126_s3, 128  ;;  %s6053_s29 = sshll.u32 %s6123_s22, 4  ;;  %s6054_s29 = int_to_ptr.vmem [resolvable:$false] %s6053_s29 }
 0x774   : > { %p6050_p1 = scmp.ne.s32.totalorder %s7126_s3, %s6049_s16  ;;  %s6055_s17 = scalar_lea.vmem %s6054_s29, 256 }
 0x775   : > { %p6056_p4 = scmp.lt.s32.totalorder %s7126_s3, %s6054_s29  ;;  %p6057_p7 = scmp.lt.s32.totalorder %s6055_s17, %s6049_s16 }
 0x776   : > { %p6051_p2 = pnand %p6050_p1, %p6232_p5 }
 0x777   : > { %p6058_p8 = por %p6057_p7, %p6056_p4 }
 0x778   : > { %p6052_p3 = pneg %p6051_p2 }
 0x77a   : > { %p6059_p9 = pnand %p6058_p8, %p6052_p3 }
 0x833   : > { %v4809_v51 = vpop.f32.mrb[52].mxu1 }
 0x834   : > { %v4810_v52 = vadd.f32 %v4809_v51, %v4724_v48  ;;  %v5745_v18 = vpop.f32.mrb[53].mxu1 }
 0x836   : > { %v4817_v55 = vadd.f32 %v4816_v50, %v4810_v52 }
 0x838   : > { %v5125_v56 = vmul.f32 -1.442695, %v4817_v55 }
 0x83a   : > { %6011 = vpow2.f32 %v5125_v56 }
 0x844   : > { %v6012_v57 = vpop.eup %6011 }
 0x845   : > { %v4821_v58 = vadd.f32 1.0, %v6012_v57 }
 0x847   : > { %6013 = vrcp.f32 %v4821_v58 }
 0x851   : > { %v6014_v59 = vpop.eup %6013 }
 0x852   : > { %v4825_v20 = vsub.f32 1.0, %v6014_v59  ;;  %v4824_v54 = vmul.f32 %v6014_v59, %v4638_v47 }
 0x854   : > { %v4826_v9 = vmul.f32 %v7071_v8, %v4825_v20 }
 0x856   : > { %v4827_v7 = vadd.f32 %v4826_v9, %v4824_v54 }
 0x858   : > { %4847 = vst.msk [vmem:[%s487_s21] sm:$0xff] %vm693_vm4, %v4827_v7 }
 0x859   : > { %6062 = shalt.err (!%p6059_p9)
}
 0x85a   : > { %s6063_s30 = scalar_lea.hbm %s7124_s5, 128  ;;  %s6067_s27 = scalar_lea.hbm %s7180_s12, 256 }
 0x85b   : > { %p6064_p10 = scmp.ne.s32.totalorder %s7124_s5, %s6063_s30  ;;  %p6068_p13 = scmp.lt.u32.totalorder %s7124_s5, %s7180_s12 }
 0x85c   : > { %p6069_p0 = scmp.lt.u32.totalorder %s6067_s27, %s6063_s30  ;;  %p6071_p2 = scmp.lt.u32.totalorder %s6063_s30, %s7124_s5 }
 0x85d   : > { %p6065_p11 = pnand %p6064_p10, %p6232_p5 }
 0x85e   : > { %p6070_p1 = por %p6069_p0, %p6068_p13 }
 0x85f   : > { %p6066_p12 = pneg %p6065_p11 }
 0x860   : > { %p6072_p3 = por %p6071_p2, %p6070_p1 }
 0x862   : > { %p6073_p4 = pnand %p6072_p3, %p6066_p12 }
 0x864   : > { %6076 = shalt.err (!%p6073_p4)
}
 0x865   : > { %5908 = dma.vmem_to_hbm [thread:$0]  (%p6232_p5), %s7126_s3, 128, %s7124_s5, %s4850_s15  }
 0x866 PF: > { %p5919_p7 = scmp.ge.s32.totalorder %s6115_s28, 2  ;;  %s4893_s23 = sand.u32 1, %s6103_s25  }
 0x867   : > { %s4894_s16 = scalar_lea.sflag [#allocation3], %s4893_s23 }
 0x868   : > { %p5913_p8 = pnand %p5919_p7, %p6236_p6 }
 0x86a   : > { %6094 = dma.done.wait (!%p5913_p8), %s4894_s16, 128  }
 0x86b   : > { %6096 = vsyncadd (!%p5913_p8), %s4894_s16, 4294967168  ;;  %s4903_s22 = scalar_lea.sflag [#allocation5], %s4893_s23 }
 0x86c   : > { %6098 = dma.done.wait (!%p5913_p8), %s4903_s22, 128  }
 0x86d   : > { %6100 = vsyncadd (!%p5913_p8), %s4903_s22, 4294967168  ;;  %s7195_s18 = sld [smem:[#allocation8_spill]]  ;;  %s7196_s27 = sld [smem:[#allocation9_spill]] }
 0x86e   : > { %p27_p5 = scmp.ge.s32.totalorder %s6219_s14, 4   ;;  %s7197_s25 = smov %s6107_s26 }
 0x86f   : > { %s7199_s28 = smov %s6219_s14 }
 0x870   :  { %29 = sbr.rel (!%p27_p5) target bundleno = 9 (0x9), region = 132 }
 0x873   : > { %s7198_s26 = smov %s7195_s18 }
 0x877   :  { %4908 = vsyncpa [#allocation3], 1 }
 0x878   :  { %4910 = vsyncpa [#allocation3 + $0x1], 1 }
 0x879   :  { %4911 = vsyncpa [#allocation5], 1 }
 0x87a   :  { %4913 = vsyncpa [#allocation5 + $0x1], 1 }

</bundles_post_ra>
